<compile_context>
chip_gen: v7x
topology: tpu7x:2x2x1
jax: 0.10.0
libtpu: 0.0.40
codegen_flags: <defaults>
</compile_context>

<pallas_src>
import numpy as np

import jax
import jax.numpy as jnp
from jax import lax
from jax.experimental import pallas as pl
from jax.experimental.pallas import tpu as pltpu


# ----------------------------------------------------------------------------
# In-kernel helpers
# ----------------------------------------------------------------------------
def _conv_rows(in_ref, w_ref, bias, store, Bb, Ho, Wo):
    """Stride-1 VALID conv on (H, W*Bb, C)-laid-out bf16 activations.

    in_ref : (Hi, Wi*Bb, Ci)  bf16
    w_ref  : (k, k, Ci, Co)   bf16, resident
    bias   : (1, Co)          f32 value (loaded once by the caller)
    store  : callable(h, acc_f32) that writes one output row (post bias+ReLU)
    """
    k = w_ref.shape[0]
    Co = w_ref.shape[-1]
    WoBb = Wo * Bb

    def row(h, carry):
        acc = jnp.zeros((WoBb, Co), jnp.float32)
        for dy in range(k):
            for dx in range(k):
                slab = in_ref[h + dy, pl.ds(dx * Bb, WoBb)]      # bf16, aligned
                acc = acc + jnp.dot(slab, w_ref[dy, dx],
                                    preferred_element_type=jnp.float32)
        store(h, jnp.maximum(acc + bias, 0.0))
        return carry

    lax.fori_loop(0, Ho, row, 0)


def _dqn_kernel(x_ref, w1_ref, b1_ref, w2_ref, b2_ref, w3_ref, b3_ref,
                w4_ref, b4_ref, w5_ref, b5_ref, o_ref,
                act1_ref, act2_ref, fc_in_ref):
    Bb = o_ref.shape[0]
    C3 = w3_ref.shape[-1]
    H3, _, WC3 = fc_in_ref.shape
    W3 = WC3 // C3
    Nfc = w4_ref.shape[-1]

    # conv1 (8x8 / stride 4): a 2x2 stride-1 conv over the space-to-depth(8)
    # input; the 4 output-parity classes are fused into 128 output channels.
    def store_act1(h, a):
        act1_ref[h] = a.astype(jnp.bfloat16)
    _conv_rows(x_ref, w1_ref, b1_ref[...], store_act1,
               Bb, act1_ref.shape[0], act1_ref.shape[1] // Bb)

    # conv2 (4x4 / stride 2): a 2x2 stride-1 conv over the parity-blocked act1.
    def store_act2(h, a):
        act2_ref[h] = a.astype(jnp.bfloat16)
    _conv_rows(act1_ref, w2_ref, b2_ref[...], store_act2,
               Bb, act2_ref.shape[0], act2_ref.shape[1] // Bb)

    # conv3 (3x3 / stride 1): epilogue stages each output row directly into the
    # fc-friendly (H3, Bb, W3*C3) layout so fc1 runs with K = W3*C3.
    def store_fc_in(h, a):
        a = a.astype(jnp.bfloat16)                               # (W3*Bb, C3)
        parts = [a[w * Bb:(w + 1) * Bb, :] for w in range(W3)]
        fc_in_ref[h] = jnp.concatenate(parts, axis=-1)
    _conv_rows(act2_ref, w3_ref, b3_ref[...], store_fc_in, Bb, H3, W3)

    # fc1 (H3 matmuls of K = W3*C3) + fc2 fused epilogue; the 512-wide hidden
    # never leaves VMEM.  fc2 output width is lane-padded to 128 -> dense vst.
    def fc_body(h, acc):
        return acc + jnp.dot(fc_in_ref[h], w4_ref[h],
                             preferred_element_type=jnp.float32)
    acc = lax.fori_loop(0, H3, fc_body, jnp.zeros((Bb, Nfc), jnp.float32))
    hid = jnp.maximum(acc + b4_ref[...], 0.0).astype(jnp.bfloat16)
    q = jnp.dot(hid, w5_ref[...], preferred_element_type=jnp.float32) + b5_ref[...]
    o_ref[...] = q.astype(o_ref.dtype)


# ----------------------------------------------------------------------------
# XLA-side input prep: 1x-data space-to-depth(8) + batch blocking, shipped bf16
# ----------------------------------------------------------------------------
def _prep_input(x, block_batch):
    """NCHW (f32 or uint8) -> (n_blocks, Hs, Ws*Bb, 64*C) bf16."""
    if x.dtype == jnp.uint8:
        x = x.astype(jnp.float32) / 255.0
    x = x.astype(jnp.float32)
    N, C, H, W = x.shape
    H1, W1 = (H - 8) // 4 + 1, (W - 8) // 4 + 1
    # TODO(synk): odd conv1 output sizes (H1/W1 odd) need a non-parity fallback.
    assert H1 % 2 == 0 and W1 % 2 == 0, (H1, W1)
    assert H1 >= 8 and W1 >= 8, "spatial size too small for the conv stack"
    Bb = block_batch
    Hs, Ws = H1 // 2 + 1, W1 // 2 + 1
    nb = (N + Bb - 1) // Bb
    x = jnp.pad(x, ((0, nb * Bb - N), (0, 0), (0, 8 * Hs - H), (0, 8 * Ws - W)))
    x = x.reshape(nb, Bb, C, Hs, 8, Ws, 8)
    x = jnp.transpose(x, (0, 3, 5, 1, 4, 6, 2))   # (nb, Hs, Ws, Bb, r8, c8, C)
    # TODO(synk): keep the observation uint8 end-to-end and do the *(1/255)
    # scale on the VPU inside the kernel to quarter (vs. halve) the input DMA.
    return x.reshape(nb, Hs, Ws * Bb, 64 * C).astype(jnp.bfloat16)


def _pick_block_batch(n, max_block_batch):
    # Bb must be a multiple of 16 so every sublane slice (tap offsets dx*Bb and
    # the per-image fc staging slices) stays aligned to the bf16 (16,128) tile.
    # v5e/v6e (1 TC): prefer the largest Bb that fits.  v7x (2 TCs): pass
    # max_block_batch=16 for batch>=32 so the 'parallel' grid has >=2 steps.
    # TODO(synk): a dedicated Bb=8 / f32-activation path would avoid padding
    # waste for actor-side batch-1 inference.
    bb_max = max(16, (max_block_batch // 16) * 16)
    bb = min(bb_max, ((n + 15) // 16) * 16)
    return max(16, bb)


# ----------------------------------------------------------------------------
# Forward pass (single pallas_call)
# ----------------------------------------------------------------------------
def dqn_forward(prepared, x, *, num_actions, max_block_batch=32):
    N = x.shape[0]
    Bb = _pick_block_batch(N, max_block_batch)
    assert Bb % 16 == 0
    xp = _prep_input(x, Bb)                       # (nb, Hs, Ws*Bb, 64*C) bf16
    nb, Hs, WsBb, Cs = xp.shape
    Ws = WsBb // Bb
    Hb1, Wb1 = Hs - 1, Ws - 1                     # conv1 output / 2 (parity blocks)
    H2, W2 = Hb1 - 1, Wb1 - 1                     # conv2 output
    H3, W3 = H2 - 2, W2 - 2                       # conv3 output
    C1 = prepared["w1"].shape[-1]                 # 128 (= 4 parities x 32)
    C2 = prepared["w2"].shape[-1]                 # 64
    C3 = prepared["w3"].shape[-1]                 # 64
    Nfc = prepared["w4"].shape[-1]                # 512
    Ap = prepared["w5"].shape[-1]                 # lane-padded num_actions (128)
    assert prepared["w4"].shape[:2] == (H3, W3 * C3), "params/input mismatch"
    assert num_actions <= Ap

    weights = [prepared[k] for k in
               ("w1", "b1", "w2", "b2", "w3", "b3", "w4", "b4", "w5", "b5")]

    def _resident_spec(a):
        zeros = (0,) * a.ndim
        return pl.BlockSpec(a.shape, lambda i, _z=zeros: _z)

    macs = (Hb1 * Wb1 * 4 * Cs * C1
            + H2 * W2 * 4 * C1 * C2
            + H3 * W3 * 9 * C2 * C3
            + H3 * W3 * C3 * Nfc
            + Nfc * Ap)
    flops = 2 * nb * Bb * macs
    bytes_accessed = (int(xp.size) * xp.dtype.itemsize
                      + sum(int(a.size) * a.dtype.itemsize for a in weights)
                      + nb * Bb * Ap * 4)

    out = pl.pallas_call(
        _dqn_kernel,
        out_shape=jax.ShapeDtypeStruct((nb * Bb, Ap), jnp.float32),
        grid=(nb,),
        in_specs=[pl.BlockSpec((None, Hs, WsBb, Cs), lambda i: (i, 0, 0, 0))]
                 + [_resident_spec(a) for a in weights],
        out_specs=pl.BlockSpec((Bb, Ap), lambda i: (i, 0)),
        scratch_shapes=[
            pltpu.VMEM((Hb1, Wb1 * Bb, C1), jnp.bfloat16),   # conv1 (parity-blocked)
            pltpu.VMEM((H2, W2 * Bb, C2), jnp.bfloat16),     # conv2
            pltpu.VMEM((H3, Bb, W3 * C3), jnp.bfloat16),     # conv3 in fc layout
        ],
        compiler_params=pltpu.CompilerParams(
            dimension_semantics=("parallel",),
            vmem_limit_bytes=48 * 1024 * 1024),
        cost_estimate=pl.CostEstimate(flops=flops, transcendentals=0,
                                      bytes_accessed=bytes_accessed),
    )(xp, *weights)
    return out[:N, :num_actions]


# ----------------------------------------------------------------------------
# Parameters: PyTorch-layout init + one-time kernel-layout preparation
# ----------------------------------------------------------------------------
def _conv_out(h, k, s):
    return (h - k) // s + 1


def init_dqn_params(key, input_shape, num_actions):
    C, H, W = input_shape
    h1, w1 = _conv_out(H, 8, 4), _conv_out(W, 8, 4)
    h2, w2 = _conv_out(h1, 4, 2), _conv_out(w1, 4, 2)
    h3, w3 = _conv_out(h2, 3, 1), _conv_out(w2, 3, 1)
    conv_out_size = 64 * h3 * w3

    ks = jax.random.split(key, 10)

    def u(k_, shape, fan_in):
        bound = 1.0 / jnp.sqrt(jnp.float32(fan_in))
        return jax.random.uniform(k_, shape, jnp.float32, -bound, bound)

    return {
        "conv1_w": u(ks[0], (32, C, 8, 8), C * 8 * 8),
        "conv1_b": u(ks[1], (32,), C * 8 * 8),
        "conv2_w": u(ks[2], (64, 32, 4, 4), 32 * 4 * 4),
        "conv2_b": u(ks[3], (64,), 32 * 4 * 4),
        "conv3_w": u(ks[4], (64, 64, 3, 3), 64 * 3 * 3),
        "conv3_b": u(ks[5], (64,), 64 * 3 * 3),
        "fc1_w":   u(ks[6], (512, conv_out_size), conv_out_size),
        "fc1_b":   u(ks[7], (512,), conv_out_size),
        "fc2_w":   u(ks[8], (num_actions, 512), 512),
        "fc2_b":   u(ks[9], (num_actions,), 512),
    }


def prepare_params(params, input_shape, lane_pad=128):
    """One-time rearrangement of PyTorch-layout weights into kernel layout."""
    C, H, W = input_shape
    H1, W1 = _conv_out(H, 8, 4), _conv_out(W, 8, 4)
    H2, W2 = _conv_out(H1, 4, 2), _conv_out(W1, 4, 2)
    H3, W3 = H2 - 2, W2 - 2

    # conv1: fuse stride-4 + the 4 output-parity classes into a 2x2 stride-1
    # conv over the space-to-depth(8) input:  (2, 2, 64*C, 4*32)
    w1 = np.asarray(params["conv1_w"], np.float32)          # (32, C, 8, 8)
    O1 = w1.shape[0]
    k16 = np.zeros((2, 2, O1, C, 16, 16), np.float32)
    for p in range(2):
        for q in range(2):
            k16[p, q, :, :, 4 * p:4 * p + 8, 4 * q:4 * q + 8] = w1
    k16 = k16.reshape(2, 2, O1, C, 2, 8, 2, 8)               # (p,q,o,c,a,r8,b,c8)
    w1p = k16.transpose(4, 6, 5, 7, 3, 0, 1, 2).reshape(2, 2, 64 * C, 4 * O1)
    b1p = np.tile(np.asarray(params["conv1_b"], np.float32), 4)[None, :]

    # conv2: stride-2 4x4 over conv1 output == 2x2 stride-1 over the
    # parity-blocked (128-channel) act1:  (2, 2, 4*32, 64)
    w2 = np.asarray(params["conv2_w"], np.float32)           # (64, 32, 4, 4)
    O2, C2 = w2.shape[0], w2.shape[1]
    w2p = (w2.reshape(O2, C2, 2, 2, 2, 2)                    # (o,c,a,p,b,q)
             .transpose(2, 4, 3, 5, 1, 0)                    # (a,b,p,q,c,o)
             .reshape(2, 2, 4 * C2, O2))
    b2 = np.asarray(params["conv2_b"], np.float32)[None, :]

    # conv3: plain (3, 3, Cin, Cout)
    w3 = np.asarray(params["conv3_w"], np.float32)           # (64, 64, 3, 3)
    O3 = w3.shape[0]
    w3r = w3.transpose(2, 3, 1, 0)
    b3 = np.asarray(params["conv3_b"], np.float32)[None, :]

    # fc1: fold PyTorch's NCHW flatten order into the weight, laid out to match
    # the in-kernel fc staging -> (H3, W3*64, 512)
    fc1_w = np.asarray(params["fc1_w"], np.float32)
    w4 = (fc1_w.reshape(fc1_w.shape[0], O3, H3, W3)
              .transpose(2, 3, 1, 0)                          # (H3, W3, C3, 512)
              .reshape(H3, W3 * O3, fc1_w.shape[0]))
    b4 = np.asarray(params["fc1_b"], np.float32)[None, :]

    # fc2: (512, A) zero-padded to a lane-dense width (multiple of 128) so the
    # kernel's output store is unmasked; wrapper slices [:, :A].
    w5 = np.asarray(params["fc2_w"], np.float32).T            # (512, A)
    A = w5.shape[1]
    Ap = ((A + lane_pad - 1) // lane_pad) * lane_pad
    w5p = np.zeros((w5.shape[0], Ap), np.float32)
    w5p[:, :A] = w5
    b5p = np.zeros((1, Ap), np.float32)
    b5p[0, :A] = np.asarray(params["fc2_b"], np.float32)

    bf = lambda a: jnp.asarray(a, jnp.bfloat16)
    f32 = lambda a: jnp.asarray(a, jnp.float32)
    return {"w1": bf(w1p), "b1": f32(b1p), "w2": bf(w2p), "b2": f32(b2),
            "w3": bf(w3r), "b3": f32(b3), "w4": bf(w4), "b4": f32(b4),
            "w5": bf(w5p), "b5": f32(b5p)}


# ----------------------------------------------------------------------------
# Pure-JAX reference (correctness check only)
# ----------------------------------------------------------------------------
def dqn_ref(params, x):
    if x.dtype == jnp.uint8:
        x = x.astype(jnp.float32) / 255.0

    def conv(x_, w, b, s):
        y = jax.lax.conv_general_dilated(
            x_, w, (s, s), "VALID",
            dimension_numbers=("NCHW", "OIHW", "NCHW"))
        return jax.nn.relu(y + b[None, :, None, None])

    x = conv(x, params["conv1_w"], params["conv1_b"], 4)
    x = conv(x, params["conv2_w"], params["conv2_b"], 2)
    x = conv(x, params["conv3_w"], params["conv3_b"], 1)
    x = x.reshape(x.shape[0], -1)
    x = jax.nn.relu(x @ params["fc1_w"].T + params["fc1_b"])
    return x @ params["fc2_w"].T + params["fc2_b"]


if __name__ == "__main__":
    # 36x36 is the smallest spatial size the conv stack supports.
    input_shape = (4, 36, 36)          # (C, H, W)
    num_actions = 6
    batch = 2

    key = jax.random.PRNGKey(0)
    pkey, xkey = jax.random.split(key)
    params = init_dqn_params(pkey, input_shape, num_actions)
    prepared = prepare_params(params, input_shape)
    x = jax.random.uniform(xkey, (batch,) + input_shape, jnp.float32)

    fwd = jax.jit(dqn_forward, static_argnames=("num_actions", "max_block_batch"))
    q = jax.block_until_ready(fwd(prepared, x, num_actions=num_actions))
    assert q.shape == (batch, num_actions), q.shape

    q_ref = dqn_ref(params, x)
    max_err = float(jnp.max(jnp.abs(q - q_ref)))
    # bf16 MXU inputs + bf16 input/activations (f32 accumulation) -> loosened
    # tolerance vs the f32 reference.
    assert jnp.allclose(q, q_ref, atol=5e-2, rtol=5e-2), max_err

    print("KERNEL_OK")
</pallas_src>

<mosaic_0001>
module attributes {stable_mosaic.version = 11 : i64} {
  func.func @_dqn_kernel(%arg0: i32, %arg1: memref<1x5x80x256xbf16, #tpu.memory_space<vmem>>, %arg2: memref<2x2x256x128xbf16, #tpu.memory_space<vmem>>, %arg3: memref<1x128xf32, #tpu.memory_space<vmem>>, %arg4: memref<2x2x128x64xbf16, #tpu.memory_space<vmem>>, %arg5: memref<1x64xf32, #tpu.memory_space<vmem>>, %arg6: memref<3x3x64x64xbf16, #tpu.memory_space<vmem>>, %arg7: memref<1x64xf32, #tpu.memory_space<vmem>>, %arg8: memref<1x64x512xbf16, #tpu.memory_space<vmem>>, %arg9: memref<1x512xf32, #tpu.memory_space<vmem>>, %arg10: memref<512x128xbf16, #tpu.memory_space<vmem>>, %arg11: memref<1x128xf32, #tpu.memory_space<vmem>>, %arg12: memref<16x128xf32, #tpu.memory_space<vmem>>, %arg13: memref<4x64x128xbf16, #tpu.memory_space<vmem>>, %arg14: memref<3x48x64xbf16, #tpu.memory_space<vmem>>, %arg15: memref<1x16x64xbf16, #tpu.memory_space<vmem>>) attributes {dimension_semantics = [#tpu.dimension_semantics<parallel>], iteration_bounds = array<i64: 1>, scalar_prefetch = 0 : i64, scratch_operands = 3 : i64, tpu.core_type = #tpu.core_type<tc>, window_params = [{transform_indices = @transform_0, window_bounds = array<i64: 1, 5, 80, 256>}, {pipeline_mode = #tpu.pipeline_mode<synchronous>, transform_indices = @transform_1, window_bounds = array<i64: 2, 2, 256, 128>}, {pipeline_mode = #tpu.pipeline_mode<synchronous>, transform_indices = @transform_2, window_bounds = array<i64: 1, 128>}, {pipeline_mode = #tpu.pipeline_mode<synchronous>, transform_indices = @transform_3, window_bounds = array<i64: 2, 2, 128, 64>}, {pipeline_mode = #tpu.pipeline_mode<synchronous>, transform_indices = @transform_4, window_bounds = array<i64: 1, 64>}, {pipeline_mode = #tpu.pipeline_mode<synchronous>, transform_indices = @transform_5, window_bounds = array<i64: 3, 3, 64, 64>}, {pipeline_mode = #tpu.pipeline_mode<synchronous>, transform_indices = @transform_6, window_bounds = array<i64: 1, 64>}, {pipeline_mode = #tpu.pipeline_mode<synchronous>, transform_indices = @transform_7, window_bounds = array<i64: 1, 64, 512>}, {pipeline_mode = #tpu.pipeline_mode<synchronous>, transform_indices = @transform_8, window_bounds = array<i64: 1, 512>}, {pipeline_mode = #tpu.pipeline_mode<synchronous>, transform_indices = @transform_9, window_bounds = array<i64: 512, 128>}, {pipeline_mode = #tpu.pipeline_mode<synchronous>, transform_indices = @transform_10, window_bounds = array<i64: 1, 128>}, {transform_indices = @transform_11, window_bounds = array<i64: 16, 128>}]} {
    %c0 = arith.constant 0 : index
    %c0_0 = arith.constant 0 : index
    %0 = vector.load %arg3[%c0, %c0_0] : memref<1x128xf32, #tpu.memory_space<vmem>>, vector<1x128xf32>
    %c0_i32 = arith.constant 0 : i32
    %c4_i32 = arith.constant 4 : i32
    %1 = arith.addi %c0_i32, %c4_i32 : i32
    %c1_i32 = arith.constant 1 : i32
    scf.for %arg16 = %c0_i32 to %1 step %c1_i32  : i32 {
      %cst_99 = arith.constant 0.000000e+00 : f32
      %108 = vector.broadcast %cst_99 : f32 to vector<64x128xf32>
      %c0_i32_100 = arith.constant 0 : i32
      %109 = arith.addi %arg16, %c0_i32_100 : i32
      %c0_101 = arith.constant 0 : index
      %110 = arith.index_cast %109 : i32 to index
      %c0_102 = arith.constant 0 : index
      %c0_103 = arith.constant 0 : index
      %111 = vector.load %arg1[%c0_101, %110, %c0_102, %c0_103] : memref<1x5x80x256xbf16, #tpu.memory_space<vmem>>, vector<1x1x64x256xbf16>
      %112 = vector.shape_cast %111 : vector<1x1x64x256xbf16> to vector<64x256xbf16>
      %c0_104 = arith.constant 0 : index
      %c0_105 = arith.constant 0 : index
      %c0_106 = arith.constant 0 : index
      %c0_107 = arith.constant 0 : index
      %113 = vector.load %arg2[%c0_104, %c0_105, %c0_106, %c0_107] : memref<2x2x256x128xbf16, #tpu.memory_space<vmem>>, vector<1x1x256x128xbf16>
      %114 = vector.shape_cast %113 : vector<1x1x256x128xbf16> to vector<256x128xbf16>
      %cst_108 = arith.constant dense<0.000000e+00> : vector<64x128xf32>
      %115 = tpu.matmul %112, %114, %cst_108 {dimension_numbers = #tpu.dot_dimension_numbers<[1], [0], [0], [1], [0, 0, 1, 1], [], []>} : vector<64x256xbf16>, vector<256x128xbf16>, vector<64x128xf32> -> vector<64x128xf32>
      %116 = arith.addf %108, %115 : vector<64x128xf32>
      %c0_i32_109 = arith.constant 0 : i32
      %117 = arith.addi %arg16, %c0_i32_109 : i32
      %c0_110 = arith.constant 0 : index
      %118 = arith.index_cast %117 : i32 to index
      %c16_111 = arith.constant 16 : index
      %c0_112 = arith.constant 0 : index
      %119 = vector.load %arg1[%c0_110, %118, %c16_111, %c0_112] : memref<1x5x80x256xbf16, #tpu.memory_space<vmem>>, vector<1x1x64x256xbf16>
      %120 = vector.shape_cast %119 : vector<1x1x64x256xbf16> to vector<64x256xbf16>
      %c0_113 = arith.constant 0 : index
      %c1_114 = arith.constant 1 : index
      %c0_115 = arith.constant 0 : index
      %c0_116 = arith.constant 0 : index
      %121 = vector.load %arg2[%c0_113, %c1_114, %c0_115, %c0_116] : memref<2x2x256x128xbf16, #tpu.memory_space<vmem>>, vector<1x1x256x128xbf16>
      %122 = vector.shape_cast %121 : vector<1x1x256x128xbf16> to vector<256x128xbf16>
      %cst_117 = arith.constant dense<0.000000e+00> : vector<64x128xf32>
      %123 = tpu.matmul %120, %122, %cst_117 {dimension_numbers = #tpu.dot_dimension_numbers<[1], [0], [0], [1], [0, 0, 1, 1], [], []>} : vector<64x256xbf16>, vector<256x128xbf16>, vector<64x128xf32> -> vector<64x128xf32>
      %124 = arith.addf %116, %123 : vector<64x128xf32>
      %c1_i32_118 = arith.constant 1 : i32
      %125 = arith.addi %arg16, %c1_i32_118 : i32
      %c0_119 = arith.constant 0 : index
      %126 = arith.index_cast %125 : i32 to index
      %c0_120 = arith.constant 0 : index
      %c0_121 = arith.constant 0 : index
      %127 = vector.load %arg1[%c0_119, %126, %c0_120, %c0_121] : memref<1x5x80x256xbf16, #tpu.memory_space<vmem>>, vector<1x1x64x256xbf16>
      %128 = vector.shape_cast %127 : vector<1x1x64x256xbf16> to vector<64x256xbf16>
      %c1_122 = arith.constant 1 : index
      %c0_123 = arith.constant 0 : index
      %c0_124 = arith.constant 0 : index
      %c0_125 = arith.constant 0 : index
      %129 = vector.load %arg2[%c1_122, %c0_123, %c0_124, %c0_125] : memref<2x2x256x128xbf16, #tpu.memory_space<vmem>>, vector<1x1x256x128xbf16>
      %130 = vector.shape_cast %129 : vector<1x1x256x128xbf16> to vector<256x128xbf16>
      %cst_126 = arith.constant dense<0.000000e+00> : vector<64x128xf32>
      %131 = tpu.matmul %128, %130, %cst_126 {dimension_numbers = #tpu.dot_dimension_numbers<[1], [0], [0], [1], [0, 0, 1, 1], [], []>} : vector<64x256xbf16>, vector<256x128xbf16>, vector<64x128xf32> -> vector<64x128xf32>
      %132 = arith.addf %124, %131 : vector<64x128xf32>
      %c1_i32_127 = arith.constant 1 : i32
      %133 = arith.addi %arg16, %c1_i32_127 : i32
      %c0_128 = arith.constant 0 : index
      %134 = arith.index_cast %133 : i32 to index
      %c16_129 = arith.constant 16 : index
      %c0_130 = arith.constant 0 : index
      %135 = vector.load %arg1[%c0_128, %134, %c16_129, %c0_130] : memref<1x5x80x256xbf16, #tpu.memory_space<vmem>>, vector<1x1x64x256xbf16>
      %136 = vector.shape_cast %135 : vector<1x1x64x256xbf16> to vector<64x256xbf16>
      %c1_131 = arith.constant 1 : index
      %c1_132 = arith.constant 1 : index
      %c0_133 = arith.constant 0 : index
      %c0_134 = arith.constant 0 : index
      %137 = vector.load %arg2[%c1_131, %c1_132, %c0_133, %c0_134] : memref<2x2x256x128xbf16, #tpu.memory_space<vmem>>, vector<1x1x256x128xbf16>
      %138 = vector.shape_cast %137 : vector<1x1x256x128xbf16> to vector<256x128xbf16>
      %cst_135 = arith.constant dense<0.000000e+00> : vector<64x128xf32>
      %139 = tpu.matmul %136, %138, %cst_135 {dimension_numbers = #tpu.dot_dimension_numbers<[1], [0], [0], [1], [0, 0, 1, 1], [], []>} : vector<64x256xbf16>, vector<256x128xbf16>, vector<64x128xf32> -> vector<64x128xf32>
      %140 = arith.addf %132, %139 : vector<64x128xf32>
      %141 = vector.broadcast %0 : vector<1x128xf32> to vector<64x128xf32>
      %142 = arith.addf %140, %141 : vector<64x128xf32>
      %cst_136 = arith.constant 0.000000e+00 : f32
      %143 = vector.broadcast %cst_136 : f32 to vector<64x128xf32>
      %144 = arith.maximumf %142, %143 : vector<64x128xf32>
      %145 = arith.truncf %144 : vector<64x128xf32> to vector<64x128xbf16>
      %146 = arith.index_cast %arg16 : i32 to index
      %c0_137 = arith.constant 0 : index
      %c0_138 = arith.constant 0 : index
      %147 = vector.load %arg13[%146, %c0_137, %c0_138] : memref<4x64x128xbf16, #tpu.memory_space<vmem>>, vector<1x64x128xbf16>
      %148 = vector.shape_cast %147 : vector<1x64x128xbf16> to vector<64x128xbf16>
      %149 = vector.shape_cast %145 : vector<64x128xbf16> to vector<1x64x128xbf16>
      tpu.vector_store %arg13[%146, %c0_137, %c0_138], %149 {strides = array<i32>} : memref<4x64x128xbf16, #tpu.memory_space<vmem>>, vector<1x64x128xbf16>,
    }
    %c4_i32_1 = arith.constant 4 : i32
    %c0_2 = arith.constant 0 : index
    %c0_3 = arith.constant 0 : index
    %2 = vector.load %arg5[%c0_2, %c0_3] : memref<1x64xf32, #tpu.memory_space<vmem>>, vector<1x64xf32>
    %c0_i32_4 = arith.constant 0 : i32
    %c3_i32 = arith.constant 3 : i32
    %3 = arith.addi %c0_i32_4, %c3_i32 : i32
    %c1_i32_5 = arith.constant 1 : i32
    scf.for %arg16 = %c0_i32_4 to %3 step %c1_i32_5  : i32 {
      %cst_99 = arith.constant 0.000000e+00 : f32
      %108 = vector.broadcast %cst_99 : f32 to vector<48x64xf32>
      %c0_i32_100 = arith.constant 0 : i32
      %109 = arith.addi %arg16, %c0_i32_100 : i32
      %110 = arith.index_cast %109 : i32 to index
      %c0_101 = arith.constant 0 : index
      %c0_102 = arith.constant 0 : index
      %111 = vector.load %arg13[%110, %c0_101, %c0_102] : memref<4x64x128xbf16, #tpu.memory_space<vmem>>, vector<1x48x128xbf16>
      %112 = vector.shape_cast %111 : vector<1x48x128xbf16> to vector<48x128xbf16>
      %c0_103 = arith.constant 0 : index
      %c0_104 = arith.constant 0 : index
      %c0_105 = arith.constant 0 : index
      %c0_106 = arith.constant 0 : index
      %113 = vector.load %arg4[%c0_103, %c0_104, %c0_105, %c0_106] : memref<2x2x128x64xbf16, #tpu.memory_space<vmem>>, vector<1x1x128x64xbf16>
      %114 = vector.shape_cast %113 : vector<1x1x128x64xbf16> to vector<128x64xbf16>
      %cst_107 = arith.constant dense<0.000000e+00> : vector<48x64xf32>
      %115 = tpu.matmul %112, %114, %cst_107 {dimension_numbers = #tpu.dot_dimension_numbers<[1], [0], [0], [1], [0, 0, 1, 1], [], []>} : vector<48x128xbf16>, vector<128x64xbf16>, vector<48x64xf32> -> vector<48x64xf32>
      %116 = arith.addf %108, %115 : vector<48x64xf32>
      %c0_i32_108 = arith.constant 0 : i32
      %117 = arith.addi %arg16, %c0_i32_108 : i32
      %118 = arith.index_cast %117 : i32 to index
      %c16_109 = arith.constant 16 : index
      %c0_110 = arith.constant 0 : index
      %119 = vector.load %arg13[%118, %c16_109, %c0_110] : memref<4x64x128xbf16, #tpu.memory_space<vmem>>, vector<1x48x128xbf16>
      %120 = vector.shape_cast %119 : vector<1x48x128xbf16> to vector<48x128xbf16>
      %c0_111 = arith.constant 0 : index
      %c1_112 = arith.constant 1 : index
      %c0_113 = arith.constant 0 : index
      %c0_114 = arith.constant 0 : index
      %121 = vector.load %arg4[%c0_111, %c1_112, %c0_113, %c0_114] : memref<2x2x128x64xbf16, #tpu.memory_space<vmem>>, vector<1x1x128x64xbf16>
      %122 = vector.shape_cast %121 : vector<1x1x128x64xbf16> to vector<128x64xbf16>
      %cst_115 = arith.constant dense<0.000000e+00> : vector<48x64xf32>
      %123 = tpu.matmul %120, %122, %cst_115 {dimension_numbers = #tpu.dot_dimension_numbers<[1], [0], [0], [1], [0, 0, 1, 1], [], []>} : vector<48x128xbf16>, vector<128x64xbf16>, vector<48x64xf32> -> vector<48x64xf32>
      %124 = arith.addf %116, %123 : vector<48x64xf32>
      %c1_i32_116 = arith.constant 1 : i32
      %125 = arith.addi %arg16, %c1_i32_116 : i32
      %126 = arith.index_cast %125 : i32 to index
      %c0_117 = arith.constant 0 : index
      %c0_118 = arith.constant 0 : index
      %127 = vector.load %arg13[%126, %c0_117, %c0_118] : memref<4x64x128xbf16, #tpu.memory_space<vmem>>, vector<1x48x128xbf16>
      %128 = vector.shape_cast %127 : vector<1x48x128xbf16> to vector<48x128xbf16>
      %c1_119 = arith.constant 1 : index
      %c0_120 = arith.constant 0 : index
      %c0_121 = arith.constant 0 : index
      %c0_122 = arith.constant 0 : index
      %129 = vector.load %arg4[%c1_119, %c0_120, %c0_121, %c0_122] : memref<2x2x128x64xbf16, #tpu.memory_space<vmem>>, vector<1x1x128x64xbf16>
      %130 = vector.shape_cast %129 : vector<1x1x128x64xbf16> to vector<128x64xbf16>
      %cst_123 = arith.constant dense<0.000000e+00> : vector<48x64xf32>
      %131 = tpu.matmul %128, %130, %cst_123 {dimension_numbers = #tpu.dot_dimension_numbers<[1], [0], [0], [1], [0, 0, 1, 1], [], []>} : vector<48x128xbf16>, vector<128x64xbf16>, vector<48x64xf32> -> vector<48x64xf32>
      %132 = arith.addf %124, %131 : vector<48x64xf32>
      %c1_i32_124 = arith.constant 1 : i32
      %133 = arith.addi %arg16, %c1_i32_124 : i32
      %134 = arith.index_cast %133 : i32 to index
      %c16_125 = arith.constant 16 : index
      %c0_126 = arith.constant 0 : index
      %135 = vector.load %arg13[%134, %c16_125, %c0_126] : memref<4x64x128xbf16, #tpu.memory_space<vmem>>, vector<1x48x128xbf16>
      %136 = vector.shape_cast %135 : vector<1x48x128xbf16> to vector<48x128xbf16>
      %c1_127 = arith.constant 1 : index
      %c1_128 = arith.constant 1 : index
      %c0_129 = arith.constant 0 : index
      %c0_130 = arith.constant 0 : index
      %137 = vector.load %arg4[%c1_127, %c1_128, %c0_129, %c0_130] : memref<2x2x128x64xbf16, #tpu.memory_space<vmem>>, vector<1x1x128x64xbf16>
      %138 = vector.shape_cast %137 : vector<1x1x128x64xbf16> to vector<128x64xbf16>
      %cst_131 = arith.constant dense<0.000000e+00> : vector<48x64xf32>
      %139 = tpu.matmul %136, %138, %cst_131 {dimension_numbers = #tpu.dot_dimension_numbers<[1], [0], [0], [1], [0, 0, 1, 1], [], []>} : vector<48x128xbf16>, vector<128x64xbf16>, vector<48x64xf32> -> vector<48x64xf32>
      %140 = arith.addf %132, %139 : vector<48x64xf32>
      %141 = vector.broadcast %2 : vector<1x64xf32> to vector<48x64xf32>
      %142 = arith.addf %140, %141 : vector<48x64xf32>
      %cst_132 = arith.constant 0.000000e+00 : f32
      %143 = vector.broadcast %cst_132 : f32 to vector<48x64xf32>
      %144 = arith.maximumf %142, %143 : vector<48x64xf32>
      %145 = arith.truncf %144 : vector<48x64xf32> to vector<48x64xbf16>
      %146 = arith.index_cast %arg16 : i32 to index
      %c0_133 = arith.constant 0 : index
      %c0_134 = arith.constant 0 : index
      %147 = vector.load %arg14[%146, %c0_133, %c0_134] : memref<3x48x64xbf16, #tpu.memory_space<vmem>>, vector<1x48x64xbf16>
      %148 = vector.shape_cast %147 : vector<1x48x64xbf16> to vector<48x64xbf16>
      %149 = vector.shape_cast %145 : vector<48x64xbf16> to vector<1x48x64xbf16>
      tpu.vector_store %arg14[%146, %c0_133, %c0_134], %149 {strides = array<i32>} : memref<3x48x64xbf16, #tpu.memory_space<vmem>>, vector<1x48x64xbf16>,
    }
    %c3_i32_6 = arith.constant 3 : i32
    %c0_7 = arith.constant 0 : index
    %c0_8 = arith.constant 0 : index
    %4 = vector.load %arg7[%c0_7, %c0_8] : memref<1x64xf32, #tpu.memory_space<vmem>>, vector<1x64xf32>
    %c0_i32_9 = arith.constant 0 : i32
    %cst = arith.constant 0.000000e+00 : f32
    %5 = vector.broadcast %cst : f32 to vector<16x64xf32>
    %c0_i32_10 = arith.constant 0 : i32
    %6 = arith.addi %c0_i32_9, %c0_i32_10 : i32
    %7 = arith.index_cast %6 : i32 to index
    %c0_11 = arith.constant 0 : index
    %c0_12 = arith.constant 0 : index
    %8 = vector.load %arg14[%7, %c0_11, %c0_12] : memref<3x48x64xbf16, #tpu.memory_space<vmem>>, vector<1x16x64xbf16>
    %9 = vector.shape_cast %8 : vector<1x16x64xbf16> to vector<16x64xbf16>
    %c0_13 = arith.constant 0 : index
    %c0_14 = arith.constant 0 : index
    %c0_15 = arith.constant 0 : index
    %c0_16 = arith.constant 0 : index
    %10 = vector.load %arg6[%c0_13, %c0_14, %c0_15, %c0_16] : memref<3x3x64x64xbf16, #tpu.memory_space<vmem>>, vector<1x1x64x64xbf16>
    %11 = vector.shape_cast %10 : vector<1x1x64x64xbf16> to vector<64x64xbf16>
    %cst_17 = arith.constant dense<0.000000e+00> : vector<16x64xf32>
    %12 = tpu.matmul %9, %11, %cst_17 {dimension_numbers = #tpu.dot_dimension_numbers<[1], [0], [0], [1], [0, 0, 1, 1], [], []>} : vector<16x64xbf16>, vector<64x64xbf16>, vector<16x64xf32> -> vector<16x64xf32>
    %13 = arith.addf %5, %12 : vector<16x64xf32>
    %c0_i32_18 = arith.constant 0 : i32
    %14 = arith.addi %c0_i32_9, %c0_i32_18 : i32
    %15 = arith.index_cast %14 : i32 to index
    %c16 = arith.constant 16 : index
    %c0_19 = arith.constant 0 : index
    %16 = vector.load %arg14[%15, %c16, %c0_19] : memref<3x48x64xbf16, #tpu.memory_space<vmem>>, vector<1x16x64xbf16>
    %17 = vector.shape_cast %16 : vector<1x16x64xbf16> to vector<16x64xbf16>
    %c0_20 = arith.constant 0 : index
    %c1 = arith.constant 1 : index
    %c0_21 = arith.constant 0 : index
    %c0_22 = arith.constant 0 : index
    %18 = vector.load %arg6[%c0_20, %c1, %c0_21, %c0_22] : memref<3x3x64x64xbf16, #tpu.memory_space<vmem>>, vector<1x1x64x64xbf16>
    %19 = vector.shape_cast %18 : vector<1x1x64x64xbf16> to vector<64x64xbf16>
    %cst_23 = arith.constant dense<0.000000e+00> : vector<16x64xf32>
    %20 = tpu.matmul %17, %19, %cst_23 {dimension_numbers = #tpu.dot_dimension_numbers<[1], [0], [0], [1], [0, 0, 1, 1], [], []>} : vector<16x64xbf16>, vector<64x64xbf16>, vector<16x64xf32> -> vector<16x64xf32>
    %21 = arith.addf %13, %20 : vector<16x64xf32>
    %c0_i32_24 = arith.constant 0 : i32
    %22 = arith.addi %c0_i32_9, %c0_i32_24 : i32
    %23 = arith.index_cast %22 : i32 to index
    %c32 = arith.constant 32 : index
    %c0_25 = arith.constant 0 : index
    %24 = vector.load %arg14[%23, %c32, %c0_25] : memref<3x48x64xbf16, #tpu.memory_space<vmem>>, vector<1x16x64xbf16>
    %25 = vector.shape_cast %24 : vector<1x16x64xbf16> to vector<16x64xbf16>
    %c0_26 = arith.constant 0 : index
    %c2 = arith.constant 2 : index
    %c0_27 = arith.constant 0 : index
    %c0_28 = arith.constant 0 : index
    %26 = vector.load %arg6[%c0_26, %c2, %c0_27, %c0_28] : memref<3x3x64x64xbf16, #tpu.memory_space<vmem>>, vector<1x1x64x64xbf16>
    %27 = vector.shape_cast %26 : vector<1x1x64x64xbf16> to vector<64x64xbf16>
    %cst_29 = arith.constant dense<0.000000e+00> : vector<16x64xf32>
    %28 = tpu.matmul %25, %27, %cst_29 {dimension_numbers = #tpu.dot_dimension_numbers<[1], [0], [0], [1], [0, 0, 1, 1], [], []>} : vector<16x64xbf16>, vector<64x64xbf16>, vector<16x64xf32> -> vector<16x64xf32>
    %29 = arith.addf %21, %28 : vector<16x64xf32>
    %c1_i32_30 = arith.constant 1 : i32
    %30 = arith.addi %c0_i32_9, %c1_i32_30 : i32
    %31 = arith.index_cast %30 : i32 to index
    %c0_31 = arith.constant 0 : index
    %c0_32 = arith.constant 0 : index
    %32 = vector.load %arg14[%31, %c0_31, %c0_32] : memref<3x48x64xbf16, #tpu.memory_space<vmem>>, vector<1x16x64xbf16>
    %33 = vector.shape_cast %32 : vector<1x16x64xbf16> to vector<16x64xbf16>
    %c1_33 = arith.constant 1 : index
    %c0_34 = arith.constant 0 : index
    %c0_35 = arith.constant 0 : index
    %c0_36 = arith.constant 0 : index
    %34 = vector.load %arg6[%c1_33, %c0_34, %c0_35, %c0_36] : memref<3x3x64x64xbf16, #tpu.memory_space<vmem>>, vector<1x1x64x64xbf16>
    %35 = vector.shape_cast %34 : vector<1x1x64x64xbf16> to vector<64x64xbf16>
    %cst_37 = arith.constant dense<0.000000e+00> : vector<16x64xf32>
    %36 = tpu.matmul %33, %35, %cst_37 {dimension_numbers = #tpu.dot_dimension_numbers<[1], [0], [0], [1], [0, 0, 1, 1], [], []>} : vector<16x64xbf16>, vector<64x64xbf16>, vector<16x64xf32> -> vector<16x64xf32>
    %37 = arith.addf %29, %36 : vector<16x64xf32>
    %c1_i32_38 = arith.constant 1 : i32
    %38 = arith.addi %c0_i32_9, %c1_i32_38 : i32
    %39 = arith.index_cast %38 : i32 to index
    %c16_39 = arith.constant 16 : index
    %c0_40 = arith.constant 0 : index
    %40 = vector.load %arg14[%39, %c16_39, %c0_40] : memref<3x48x64xbf16, #tpu.memory_space<vmem>>, vector<1x16x64xbf16>
    %41 = vector.shape_cast %40 : vector<1x16x64xbf16> to vector<16x64xbf16>
    %c1_41 = arith.constant 1 : index
    %c1_42 = arith.constant 1 : index
    %c0_43 = arith.constant 0 : index
    %c0_44 = arith.constant 0 : index
    %42 = vector.load %arg6[%c1_41, %c1_42, %c0_43, %c0_44] : memref<3x3x64x64xbf16, #tpu.memory_space<vmem>>, vector<1x1x64x64xbf16>
    %43 = vector.shape_cast %42 : vector<1x1x64x64xbf16> to vector<64x64xbf16>
    %cst_45 = arith.constant dense<0.000000e+00> : vector<16x64xf32>
    %44 = tpu.matmul %41, %43, %cst_45 {dimension_numbers = #tpu.dot_dimension_numbers<[1], [0], [0], [1], [0, 0, 1, 1], [], []>} : vector<16x64xbf16>, vector<64x64xbf16>, vector<16x64xf32> -> vector<16x64xf32>
    %45 = arith.addf %37, %44 : vector<16x64xf32>
    %c1_i32_46 = arith.constant 1 : i32
    %46 = arith.addi %c0_i32_9, %c1_i32_46 : i32
    %47 = arith.index_cast %46 : i32 to index
    %c32_47 = arith.constant 32 : index
    %c0_48 = arith.constant 0 : index
    %48 = vector.load %arg14[%47, %c32_47, %c0_48] : memref<3x48x64xbf16, #tpu.memory_space<vmem>>, vector<1x16x64xbf16>
    %49 = vector.shape_cast %48 : vector<1x16x64xbf16> to vector<16x64xbf16>
    %c1_49 = arith.constant 1 : index
    %c2_50 = arith.constant 2 : index
    %c0_51 = arith.constant 0 : index
    %c0_52 = arith.constant 0 : index
    %50 = vector.load %arg6[%c1_49, %c2_50, %c0_51, %c0_52] : memref<3x3x64x64xbf16, #tpu.memory_space<vmem>>, vector<1x1x64x64xbf16>
    %51 = vector.shape_cast %50 : vector<1x1x64x64xbf16> to vector<64x64xbf16>
    %cst_53 = arith.constant dense<0.000000e+00> : vector<16x64xf32>
    %52 = tpu.matmul %49, %51, %cst_53 {dimension_numbers = #tpu.dot_dimension_numbers<[1], [0], [0], [1], [0, 0, 1, 1], [], []>} : vector<16x64xbf16>, vector<64x64xbf16>, vector<16x64xf32> -> vector<16x64xf32>
    %53 = arith.addf %45, %52 : vector<16x64xf32>
    %c2_i32 = arith.constant 2 : i32
    %54 = arith.addi %c0_i32_9, %c2_i32 : i32
    %55 = arith.index_cast %54 : i32 to index
    %c0_54 = arith.constant 0 : index
    %c0_55 = arith.constant 0 : index
    %56 = vector.load %arg14[%55, %c0_54, %c0_55] : memref<3x48x64xbf16, #tpu.memory_space<vmem>>, vector<1x16x64xbf16>
    %57 = vector.shape_cast %56 : vector<1x16x64xbf16> to vector<16x64xbf16>
    %c2_56 = arith.constant 2 : index
    %c0_57 = arith.constant 0 : index
    %c0_58 = arith.constant 0 : index
    %c0_59 = arith.constant 0 : index
    %58 = vector.load %arg6[%c2_56, %c0_57, %c0_58, %c0_59] : memref<3x3x64x64xbf16, #tpu.memory_space<vmem>>, vector<1x1x64x64xbf16>
    %59 = vector.shape_cast %58 : vector<1x1x64x64xbf16> to vector<64x64xbf16>
    %cst_60 = arith.constant dense<0.000000e+00> : vector<16x64xf32>
    %60 = tpu.matmul %57, %59, %cst_60 {dimension_numbers = #tpu.dot_dimension_numbers<[1], [0], [0], [1], [0, 0, 1, 1], [], []>} : vector<16x64xbf16>, vector<64x64xbf16>, vector<16x64xf32> -> vector<16x64xf32>
    %61 = arith.addf %53, %60 : vector<16x64xf32>
    %c2_i32_61 = arith.constant 2 : i32
    %62 = arith.addi %c0_i32_9, %c2_i32_61 : i32
    %63 = arith.index_cast %62 : i32 to index
    %c16_62 = arith.constant 16 : index
    %c0_63 = arith.constant 0 : index
    %64 = vector.load %arg14[%63, %c16_62, %c0_63] : memref<3x48x64xbf16, #tpu.memory_space<vmem>>, vector<1x16x64xbf16>
    %65 = vector.shape_cast %64 : vector<1x16x64xbf16> to vector<16x64xbf16>
    %c2_64 = arith.constant 2 : index
    %c1_65 = arith.constant 1 : index
    %c0_66 = arith.constant 0 : index
    %c0_67 = arith.constant 0 : index
    %66 = vector.load %arg6[%c2_64, %c1_65, %c0_66, %c0_67] : memref<3x3x64x64xbf16, #tpu.memory_space<vmem>>, vector<1x1x64x64xbf16>
    %67 = vector.shape_cast %66 : vector<1x1x64x64xbf16> to vector<64x64xbf16>
    %cst_68 = arith.constant dense<0.000000e+00> : vector<16x64xf32>
    %68 = tpu.matmul %65, %67, %cst_68 {dimension_numbers = #tpu.dot_dimension_numbers<[1], [0], [0], [1], [0, 0, 1, 1], [], []>} : vector<16x64xbf16>, vector<64x64xbf16>, vector<16x64xf32> -> vector<16x64xf32>
    %69 = arith.addf %61, %68 : vector<16x64xf32>
    %c2_i32_69 = arith.constant 2 : i32
    %70 = arith.addi %c0_i32_9, %c2_i32_69 : i32
    %71 = arith.index_cast %70 : i32 to index
    %c32_70 = arith.constant 32 : index
    %c0_71 = arith.constant 0 : index
    %72 = vector.load %arg14[%71, %c32_70, %c0_71] : memref<3x48x64xbf16, #tpu.memory_space<vmem>>, vector<1x16x64xbf16>
    %73 = vector.shape_cast %72 : vector<1x16x64xbf16> to vector<16x64xbf16>
    %c2_72 = arith.constant 2 : index
    %c2_73 = arith.constant 2 : index
    %c0_74 = arith.constant 0 : index
    %c0_75 = arith.constant 0 : index
    %74 = vector.load %arg6[%c2_72, %c2_73, %c0_74, %c0_75] : memref<3x3x64x64xbf16, #tpu.memory_space<vmem>>, vector<1x1x64x64xbf16>
    %75 = vector.shape_cast %74 : vector<1x1x64x64xbf16> to vector<64x64xbf16>
    %cst_76 = arith.constant dense<0.000000e+00> : vector<16x64xf32>
    %76 = tpu.matmul %73, %75, %cst_76 {dimension_numbers = #tpu.dot_dimension_numbers<[1], [0], [0], [1], [0, 0, 1, 1], [], []>} : vector<16x64xbf16>, vector<64x64xbf16>, vector<16x64xf32> -> vector<16x64xf32>
    %77 = arith.addf %69, %76 : vector<16x64xf32>
    %78 = vector.broadcast %4 : vector<1x64xf32> to vector<16x64xf32>
    %79 = arith.addf %77, %78 : vector<16x64xf32>
    %cst_77 = arith.constant 0.000000e+00 : f32
    %80 = vector.broadcast %cst_77 : f32 to vector<16x64xf32>
    %81 = arith.maximumf %79, %80 : vector<16x64xf32>
    %82 = arith.truncf %81 : vector<16x64xf32> to vector<16x64xbf16>
    %83 = arith.index_cast %c0_i32_9 : i32 to index
    %c0_78 = arith.constant 0 : index
    %c0_79 = arith.constant 0 : index
    %84 = vector.load %arg15[%83, %c0_78, %c0_79] : memref<1x16x64xbf16, #tpu.memory_space<vmem>>, vector<1x16x64xbf16>
    %85 = vector.shape_cast %84 : vector<1x16x64xbf16> to vector<16x64xbf16>
    %86 = vector.shape_cast %82 : vector<16x64xbf16> to vector<1x16x64xbf16>
    tpu.vector_store %arg15[%83, %c0_78, %c0_79], %86 {strides = array<i32>} : memref<1x16x64xbf16, #tpu.memory_space<vmem>>, vector<1x16x64xbf16>,
    %c1_i32_80 = arith.constant 1 : i32
    %cst_81 = arith.constant 0.000000e+00 : f32
    %87 = vector.broadcast %cst_81 : f32 to vector<16x512xf32>
    %c0_i32_82 = arith.constant 0 : i32
    %88 = arith.index_cast %c0_i32_82 : i32 to index
    %c0_83 = arith.constant 0 : index
    %c0_84 = arith.constant 0 : index
    %89 = vector.load %arg15[%88, %c0_83, %c0_84] : memref<1x16x64xbf16, #tpu.memory_space<vmem>>, vector<1x16x64xbf16>
    %90 = vector.shape_cast %89 : vector<1x16x64xbf16> to vector<16x64xbf16>
    %91 = arith.index_cast %c0_i32_82 : i32 to index
    %c0_85 = arith.constant 0 : index
    %c0_86 = arith.constant 0 : index
    %92 = vector.load %arg8[%91, %c0_85, %c0_86] : memref<1x64x512xbf16, #tpu.memory_space<vmem>>, vector<1x64x512xbf16>
    %93 = vector.shape_cast %92 : vector<1x64x512xbf16> to vector<64x512xbf16>
    %cst_87 = arith.constant dense<0.000000e+00> : vector<16x512xf32>
    %94 = tpu.matmul %90, %93, %cst_87 {dimension_numbers = #tpu.dot_dimension_numbers<[1], [0], [0], [1], [0, 0, 1, 1], [], []>} : vector<16x64xbf16>, vector<64x512xbf16>, vector<16x512xf32> -> vector<16x512xf32>
    %95 = arith.addf %87, %94 : vector<16x512xf32>
    %c1_i32_88 = arith.constant 1 : i32
    %c0_89 = arith.constant 0 : index
    %c0_90 = arith.constant 0 : index
    %96 = vector.load %arg9[%c0_89, %c0_90] : memref<1x512xf32, #tpu.memory_space<vmem>>, vector<1x512xf32>
    %97 = vector.broadcast %96 : vector<1x512xf32> to vector<16x512xf32>
    %98 = arith.addf %95, %97 : vector<16x512xf32>
    %cst_91 = arith.constant 0.000000e+00 : f32
    %99 = vector.broadcast %cst_91 : f32 to vector<16x512xf32>
    %100 = arith.maximumf %98, %99 : vector<16x512xf32>
    %101 = arith.truncf %100 : vector<16x512xf32> to vector<16x512xbf16>
    %c0_92 = arith.constant 0 : index
    %c0_93 = arith.constant 0 : index
    %102 = vector.load %arg10[%c0_92, %c0_93] : memref<512x128xbf16, #tpu.memory_space<vmem>>, vector<512x128xbf16>
    %cst_94 = arith.constant dense<0.000000e+00> : vector<16x128xf32>
    %103 = tpu.matmul %101, %102, %cst_94 {dimension_numbers = #tpu.dot_dimension_numbers<[1], [0], [0], [1], [0, 0, 1, 1], [], []>} : vector<16x512xbf16>, vector<512x128xbf16>, vector<16x128xf32> -> vector<16x128xf32>
    %c0_95 = arith.constant 0 : index
    %c0_96 = arith.constant 0 : index
    %104 = vector.load %arg11[%c0_95, %c0_96] : memref<1x128xf32, #tpu.memory_space<vmem>>, vector<1x128xf32>
    %105 = vector.broadcast %104 : vector<1x128xf32> to vector<16x128xf32>
    %106 = arith.addf %103, %105 : vector<16x128xf32>
    %c0_97 = arith.constant 0 : index
    %c0_98 = arith.constant 0 : index
    %107 = vector.load %arg12[%c0_97, %c0_98] : memref<16x128xf32, #tpu.memory_space<vmem>>, vector<16x128xf32>
    tpu.vector_store %arg12[%c0_97, %c0_98], %106 {strides = array<i32>} : memref<16x128xf32, #tpu.memory_space<vmem>>, vector<16x128xf32>,
    return
  }
  func.func @transform_0(%arg0: i32) -> (i32, i32, i32, i32) {
    %c0_i32 = arith.constant 0 : i32
    %c0_i32_0 = arith.constant 0 : i32
    %c0_i32_1 = arith.constant 0 : i32
    %c0_i32_2 = arith.constant 0 : i32
    return %arg0, %c0_i32, %c0_i32_0, %c0_i32_1 : i32, i32, i32, i32
  }
  func.func @transform_1(%arg0: i32) -> (i32, i32, i32, i32) {
    %c0_i32 = arith.constant 0 : i32
    %c0_i32_0 = arith.constant 0 : i32
    %c0_i32_1 = arith.constant 0 : i32
    %c0_i32_2 = arith.constant 0 : i32
    %c0_i32_3 = arith.constant 0 : i32
    return %c0_i32, %c0_i32_0, %c0_i32_1, %c0_i32_2 : i32, i32, i32, i32
  }
  func.func @transform_2(%arg0: i32) -> (i32, i32) {
    %c0_i32 = arith.constant 0 : i32
    %c0_i32_0 = arith.constant 0 : i32
    %c0_i32_1 = arith.constant 0 : i32
    return %c0_i32, %c0_i32_0 : i32, i32
  }
  func.func @transform_3(%arg0: i32) -> (i32, i32, i32, i32) {
    %c0_i32 = arith.constant 0 : i32
    %c0_i32_0 = arith.constant 0 : i32
    %c0_i32_1 = arith.constant 0 : i32
    %c0_i32_2 = arith.constant 0 : i32
    %c0_i32_3 = arith.constant 0 : i32
    return %c0_i32, %c0_i32_0, %c0_i32_1, %c0_i32_2 : i32, i32, i32, i32
  }
  func.func @transform_4(%arg0: i32) -> (i32, i32) {
    %c0_i32 = arith.constant 0 : i32
    %c0_i32_0 = arith.constant 0 : i32
    %c0_i32_1 = arith.constant 0 : i32
    return %c0_i32, %c0_i32_0 : i32, i32
  }
  func.func @transform_5(%arg0: i32) -> (i32, i32, i32, i32) {
    %c0_i32 = arith.constant 0 : i32
    %c0_i32_0 = arith.constant 0 : i32
    %c0_i32_1 = arith.constant 0 : i32
    %c0_i32_2 = arith.constant 0 : i32
    %c0_i32_3 = arith.constant 0 : i32
    return %c0_i32, %c0_i32_0, %c0_i32_1, %c0_i32_2 : i32, i32, i32, i32
  }
  func.func @transform_6(%arg0: i32) -> (i32, i32) {
    %c0_i32 = arith.constant 0 : i32
    %c0_i32_0 = arith.constant 0 : i32
    %c0_i32_1 = arith.constant 0 : i32
    return %c0_i32, %c0_i32_0 : i32, i32
  }
  func.func @transform_7(%arg0: i32) -> (i32, i32, i32) {
    %c0_i32 = arith.constant 0 : i32
    %c0_i32_0 = arith.constant 0 : i32
    %c0_i32_1 = arith.constant 0 : i32
    %c0_i32_2 = arith.constant 0 : i32
    return %c0_i32, %c0_i32_0, %c0_i32_1 : i32, i32, i32
  }
  func.func @transform_8(%arg0: i32) -> (i32, i32) {
    %c0_i32 = arith.constant 0 : i32
    %c0_i32_0 = arith.constant 0 : i32
    %c0_i32_1 = arith.constant 0 : i32
    return %c0_i32, %c0_i32_0 : i32, i32
  }
  func.func @transform_9(%arg0: i32) -> (i32, i32) {
    %c0_i32 = arith.constant 0 : i32
    %c0_i32_0 = arith.constant 0 : i32
    %c0_i32_1 = arith.constant 0 : i32
    return %c0_i32, %c0_i32_0 : i32, i32
  }
  func.func @transform_10(%arg0: i32) -> (i32, i32) {
    %c0_i32 = arith.constant 0 : i32
    %c0_i32_0 = arith.constant 0 : i32
    %c0_i32_1 = arith.constant 0 : i32
    return %c0_i32, %c0_i32_0 : i32, i32
  }
  func.func @transform_11(%arg0: i32) -> (i32, i32) {
    %c0_i32 = arith.constant 0 : i32
    %c0_i32_0 = arith.constant 0 : i32
    return %arg0, %c0_i32 : i32, i32
  }
}

</mosaic_0001>

<bundles_post_ra>
// kernel: dqn_forward.1
= control target key start
LH: loop header
LB: loop body
LE: loop exit
PB: predicated region body
PF: predicated region fallthrough
CT: control target
= control target key end

     0   :  { %s4210_s19 = smov 0   ;;  %s4985_s0 = inlined_call_operand.vmem [shape: bf16[1,5,80,256], index: 0, kind: input, shape index: {}]   ;;  %s4986_s1 = inlined_call_operand.vmem [shape: bf16[2,2,256,128], index: 1, kind: input, shape index: {}]   ;;  %s4987_s2 = inlined_call_operand.vmem [shape: f32[1,128], index: 2, kind: input, shape index: {}]   ;;  %s4988_s3 = inlined_call_operand.vmem [shape: bf16[2,2,128,64], index: 3, kind: input, shape index: {}]   ;;  %s4989_s4 = inlined_call_operand.vmem [shape: f32[1,64], index: 4, kind: input, shape index: {}]   ;;  %s4990_s5 = inlined_call_operand.vmem [shape: bf16[3,3,64,64], index: 5, kind: input, shape index: {}]   ;;  %s4991_s6 = inlined_call_operand.vmem [shape: f32[1,64], index: 6, kind: input, shape index: {}]   ;;  %s4992_s7 = inlined_call_operand.vmem [shape: bf16[1,64,512], index: 7, kind: input, shape index: {}]   ;;  %s4993_s8 = inlined_call_operand.vmem [shape: f32[1,512], index: 8, kind: input, shape index: {}]   ;;  %s4994_s9 = inlined_call_operand.vmem [shape: bf16[512,128], index: 9, kind: input, shape index: {}]   ;;  %s4995_s10 = inlined_call_operand.vmem [shape: f32[1,128], index: 10, kind: input, shape index: {}]   ;;  %s4996_s11 = inlined_call_operand.vmem [shape: f32[16,128], index: 11, kind: output, shape index: {}]  }
   0x1   :  { %v4208_v0 = vld [vmem:[%s4987_s2] ss:$0 sm:$0xff] }
   0x2 LB: > { %v3906_v1 = vld [vmem:[%s4986_s1 + $0xc0] sm:$0xff]   ;;  %v3910_v5 = vld [vmem:[%s4986_s1 + $0xc8] sm:$0xff]   ;;  %v3914_v9 = vld [vmem:[%s4986_s1 + $0xd0] sm:$0xff]   ;;  %s3368_s14 = smul.u32 80, %s4134_s19  ;;  %s4134_s19 = sphi %s4210_s19, %s45_s19  }
   0x3   : > { %v3907_v2 = vld [vmem:[%s4986_s1 + $0x40] sm:$0xff]   ;;  %3372 = vmatprep.subr.bf16.mxu0 %v3906_v1  ;;  %v3911_v6 = vld [vmem:[%s4986_s1 + $0x48] sm:$0xff]   ;;  %v3915_v10 = vld [vmem:[%s4986_s1 + $0x50] sm:$0xff]  }
   0x4   : > { %v3908_v3 = vld [vmem:[%s4986_s1 + $0x80] sm:$0xff]   ;;  %3412 = vmatprep.subr.bf16.mxu1 %v3907_v2  ;;  %v3912_v7 = vld [vmem:[%s4986_s1 + $0x88] sm:$0xff]   ;;  %v3916_v11 = vld [vmem:[%s4986_s1 + $0x90] sm:$0xff]   ;;  %s4309_s2 = scalar_lea.vmem %s4985_s0, %s3368_s14 }
   0x5   : > { %v3909_v4 = vld [vmem:[%s4986_s1] sm:$0xff]   ;;  %3373 = vmatpush3.bf16.msra.mxu0 %v3908_v3  ;;  %v3913_v8 = vld [vmem:[%s4986_s1 + $0x8] sm:$0xff]   ;;  %v3917_v12 = vld [vmem:[%s4986_s1 + $0x10] sm:$0xff]  }
   0x6   : > { %3413 = vmatpush3.bf16.msra.mxu1 %v3909_v4  ;;  %3374 = vmatprep.subr.bf16.mxu0 %v3910_v5  ;;  %v3918_v13 = vld [vmem:[%s4986_s1 + $0xd8] sm:$0xff]   ;;  %v3922_v17 = vld [vmem:[%s4986_s1 + $0xe0] sm:$0xff]   ;;  %v3926_v21 = vld [vmem:[%s4986_s1 + $0xe8] sm:$0xff]  }
   0x7   : > { %3414 = vmatprep.subr.bf16.mxu1 %v3911_v6  ;;  %v3919_v14 = vld [vmem:[%s4986_s1 + $0x58] sm:$0xff]   ;;  %v3923_v18 = vld [vmem:[%s4986_s1 + $0x60] sm:$0xff]   ;;  %v3927_v22 = vld [vmem:[%s4986_s1 + $0x68] sm:$0xff]  }
   0x8   : > { %v3920_v15 = vld [vmem:[%s4986_s1 + $0x98] sm:$0xff]   ;;  %v3924_v19 = vld [vmem:[%s4986_s1 + $0xa0] sm:$0xff]   ;;  %v3928_v23 = vld [vmem:[%s4986_s1 + $0xa8] sm:$0xff]  }
   0x9   : > { %3375 = vmatpush3.bf16.msra.mxu0 %v3912_v7  ;;  %v3921_v16 = vld [vmem:[%s4986_s1 + $0x18] sm:$0xff]   ;;  %v3925_v20 = vld [vmem:[%s4986_s1 + $0x20] sm:$0xff]   ;;  %v3929_v24 = vld [vmem:[%s4986_s1 + $0x28] sm:$0xff]  }
   0xa   : > { %3415 = vmatpush3.bf16.msra.mxu1 %v3913_v8  ;;  %3376 = vmatprep.subr.bf16.mxu0 %v3914_v9  ;;  %v3930_v25 = vld [vmem:[%s4986_s1 + $0xf0] sm:$0xff]   ;;  %v3934_v29 = vld [vmem:[%s4986_s1 + $0xf8] sm:$0xff]   ;;  %v3941_v35 = vld [vmem:[%s4309_s2] ss:$8 sps:$4 sm:$0xff]  }
   0xb   : > { %3416 = vmatprep.subr.bf16.mxu1 %v3915_v10  ;;  %v3931_v26 = vld [vmem:[%s4986_s1 + $0x70] sm:$0xff]   ;;  %v3935_v30 = vld [vmem:[%s4986_s1 + $0x78] sm:$0xff]   ;;  %v3943_v36 = vld [vmem:[%s4309_s2 + $0x4] ss:$8 sps:$4 sm:$0xff]  }
   0xc   : > { %v3932_v27 = vld [vmem:[%s4986_s1 + $0xb0] sm:$0xff]   ;;  %v3936_v31 = vld [vmem:[%s4986_s1 + $0xb8] sm:$0xff]   ;;  %v3944_v37 = vld [vmem:[%s4986_s1 + $0x140] sm:$0xff]   ;;  %463 = vmatprep.mubr.bf16.mxu1 %v3943_v36 }
   0xd   : > { %3377 = vmatpush3.bf16.msra.mxu0 %v3916_v11  ;;  %v3933_v28 = vld [vmem:[%s4986_s1 + $0x30] sm:$0xff]   ;;  %v3937_v32 = vld [vmem:[%s4986_s1 + $0x38] sm:$0xff]   ;;  %v3945_v38 = vld [vmem:[%s4986_s1 + $0x1c0] sm:$0xff]  }
   0xe   : > { %3417 = vmatpush3.bf16.msra.mxu1 %v3917_v12  ;;  %3378 = vmatprep.subr.bf16.mxu0 %v3918_v13  ;;  %v3938_v33 = vld [vmem:[%s4309_s2 + $0x10] ss:$8 sps:$4 sm:$0xff]   ;;  %v3940_v34 = vld [vmem:[%s4309_s2 + $0x14] ss:$8 sps:$4 sm:$0xff]   ;;  %v3946_v39 = vld [vmem:[%s4986_s1 + $0x100] sm:$0xff]  }
   0xf   : > { %3418 = vmatprep.subr.bf16.mxu1 %v3919_v14  ;;  %292 = vmatprep.mubr.bf16.mxu0 %v3940_v34  ;;  %v3947_v40 = vld [vmem:[%s4986_s1 + $0x180] sm:$0xff]   ;;  %v3948_v41 = vld [vmem:[%s4986_s1 + $0x148] sm:$0xff]   ;;  %v3955_v47 = vld [vmem:[%s4986_s1 + $0x150] sm:$0xff]  }
  0x10   : > { %v3949_v42 = vld [vmem:[%s4986_s1 + $0x1c8] sm:$0xff]   ;;  %v3956_v48 = vld [vmem:[%s4986_s1 + $0x1d0] sm:$0xff]   ;;  %v3959_v51 = vld [vmem:[%s4986_s1 + $0x158] sm:$0xff]  }
  0x11   : > { %3379 = vmatpush3.bf16.msra.mxu0 %v3920_v15  ;;  %v3950_v43 = vld [vmem:[%s4986_s1 + $0x108] sm:$0xff]   ;;  %v3957_v49 = vld [vmem:[%s4986_s1 + $0x110] sm:$0xff]   ;;  %v3960_v52 = vld [vmem:[%s4986_s1 + $0x1d8] sm:$0xff]  }
  0x12   : > { %3419 = vmatpush3.bf16.msra.mxu1 %v3921_v16  ;;  %3380 = vmatprep.subr.bf16.mxu0 %v3922_v17  ;;  %v3951_v44 = vld [vmem:[%s4986_s1 + $0x188] sm:$0xff]   ;;  %v3958_v50 = vld [vmem:[%s4986_s1 + $0x190] sm:$0xff]   ;;  %v3961_v53 = vld [vmem:[%s4986_s1 + $0x118] sm:$0xff]  }
  0x13   : > { %3420 = vmatprep.subr.bf16.mxu1 %v3923_v18  ;;  %v3952_v45 = vld [vmem:[%s4309_s2 + $0x24] ss:$8 sps:$4 sm:$0xff]   ;;  %v3954_v46 = vld [vmem:[%s4309_s2 + $0x20] ss:$8 sps:$4 sm:$0xff]   ;;  %v3962_v54 = vld [vmem:[%s4986_s1 + $0x198] sm:$0xff]  }
  0x14   : > { %v3963_v55 = vld [vmem:[%s4309_s2 + $0x34] ss:$8 sps:$4 sm:$0xff]   ;;  %v3965_v56 = vld [vmem:[%s4309_s2 + $0x30] ss:$8 sps:$4 sm:$0xff]   ;;  %v3966_v57 = vld [vmem:[%s4986_s1 + $0x160] sm:$0xff]  }
  0x15   : > { %3381 = vmatpush3.bf16.msra.mxu0 %v3924_v19  ;;  %v3967_v58 = vld [vmem:[%s4986_s1 + $0x1e0] sm:$0xff]   ;;  %v3970_v61 = vld [vmem:[%s4986_s1 + $0x168] sm:$0xff]   ;;  %v3977_v4 = vld [vmem:[%s4986_s1 + $0x170] sm:$0xff]  }
  0x16   : > { %3421 = vmatpush3.bf16.msra.mxu1 %v3925_v20  ;;  %3382 = vmatprep.subr.bf16.mxu0 %v3926_v21  ;;  %v3968_v59 = vld [vmem:[%s4986_s1 + $0x120] sm:$0xff]   ;;  %v3971_v62 = vld [vmem:[%s4986_s1 + $0x1e8] sm:$0xff]   ;;  %v3978_v5 = vld [vmem:[%s4986_s1 + $0x1f0] sm:$0xff]  }
  0x17   : > { %3422 = vmatprep.subr.bf16.mxu1 %v3927_v22  ;;  %v3969_v60 = vld [vmem:[%s4986_s1 + $0x1a0] sm:$0xff]   ;;  %v3972_v63 = vld [vmem:[%s4986_s1 + $0x128] sm:$0xff]   ;;  %v3979_v6 = vld [vmem:[%s4986_s1 + $0x130] sm:$0xff]  }
  0x18   : > { %v3973_v1 = vld [vmem:[%s4986_s1 + $0x1a8] sm:$0xff]   ;;  %v3980_v7 = vld [vmem:[%s4986_s1 + $0x1b0] sm:$0xff]   ;;  %v3981_v8 = vld [vmem:[%s4986_s1 + $0x178] sm:$0xff]  }
  0x19   : > { %3383 = vmatpush3.bf16.msra.mxu0 %v3928_v23  ;;  %v3974_v2 = vld [vmem:[%s4309_s2 + $0x44] ss:$8 sps:$4 sm:$0xff]   ;;  %v3976_v3 = vld [vmem:[%s4309_s2 + $0x40] ss:$8 sps:$4 sm:$0xff]   ;;  %v3982_v9 = vld [vmem:[%s4986_s1 + $0x1f8] sm:$0xff]  }
  0x1a   : > { %3423 = vmatpush3.bf16.msra.mxu1 %v3929_v24  ;;  %3384 = vmatprep.subr.bf16.mxu0 %v3930_v25  ;;  %v3983_v10 = vld [vmem:[%s4986_s1 + $0x138] sm:$0xff]   ;;  %v3988_v14 = vld [vmem:[%s4309_s2 + $0x60] ss:$8 sps:$4 sm:$0xff]   ;;  %v3990_v15 = vld [vmem:[%s4309_s2 + $0x64] ss:$8 sps:$4 sm:$0xff]  }
  0x1b   : > { %3424 = vmatprep.subr.bf16.mxu1 %v3931_v26  ;;  %v3984_v11 = vld [vmem:[%s4986_s1 + $0x1b8] sm:$0xff]   ;;  %v3994_v18 = vld [vmem:[%s4309_s2 + $0x84] ss:$8 sps:$4 sm:$0xff]   ;;  %v3996_v19 = vld [vmem:[%s4309_s2 + $0x80] ss:$8 sps:$4 sm:$0xff]  }
  0x1c   : > { %v3985_v12 = vld [vmem:[%s4309_s2 + $0x50] ss:$8 sps:$4 sm:$0xff]   ;;  %v3987_v13 = vld [vmem:[%s4309_s2 + $0x54] ss:$8 sps:$4 sm:$0xff]  }
  0x1d   : > { %3385 = vmatpush3.bf16.msra.mxu0 %v3932_v27  ;;  %v3991_v16 = vld [vmem:[%s4309_s2 + $0x74] ss:$8 sps:$4 sm:$0xff]   ;;  %v3993_v17 = vld [vmem:[%s4309_s2 + $0x70] ss:$8 sps:$4 sm:$0xff]  }
  0x1e   : > { %3425 = vmatpush3.bf16.msra.mxu1 %v3933_v28  ;;  %3386 = vmatprep.subr.bf16.mxu0 %v3934_v29  ;;  %v3997_v20 = vld [vmem:[%s4309_s2 + $0x94] ss:$8 sps:$4 sm:$0xff]   ;;  %v3999_v21 = vld [vmem:[%s4309_s2 + $0x90] ss:$8 sps:$4 sm:$0xff]   ;;  %s3369_s2 = sshll.u32 %s4134_s19, 5  ;;  %s45_s19 = sadd.s32 1, %s4134_s19  }
  0x1f   : > { %3426 = vmatprep.subr.bf16.mxu1 %v3935_v30  ;;  %s4447_s22 = scalar_lea.vmem [#allocation2], %s3369_s2  ;;  %p42_p0 = scmp.ge.s32.totalorder %s45_s19, 4  }
  0x20   :  { %s4471_s25 = smov (%p42_p0), 0  }
  0x21   : > { %3387 = vmatpush3.bf16.msra.mxu0 %v3936_v31 }
  0x22   : > { %3427 = vmatpush3.bf16.msra.mxu1 %v3937_v32  ;;  %3452 = vmatprep.subr.bf16.mxu0 %v3944_v37 }
  0x23   : > { %3492 = vmatprep.subr.bf16.mxu1 %v3945_v38 }
  0x24   : > { %293 = vmatmul.mubr.bf16.vlgmr.msra.gmra.mrb[0].mxu0 %v3938_v33 }
  0x25   : > { %464 = vmatmul.mubr.bf16.vlgmr.msra.gmra.mrb[0].mxu1 %v3941_v35  ;;  %3453 = vmatpush3.bf16.msra.mxu0 %v3946_v39 }
  0x26   : > { %471 = vmatprep.mubr.bf16.mxu1 %v3940_v34  ;;  %3493 = vmatpush3.bf16.msra.mxu1 %v3947_v40 }
  0x27   : > { %3454 = vmatprep.subr.bf16.mxu0 %v3948_v41  ;;  %3494 = vmatprep.subr.bf16.mxu1 %v3949_v42 }
  0x28   : > { %300 = vmatprep.mubr.bf16.mxu0 %v3952_v45 }
  0x29   : > { %3455 = vmatpush3.bf16.msra.mxu0 %v3950_v43 }
  0x2a   : > { %3495 = vmatpush3.bf16.msra.mxu1 %v3951_v44  ;;  %3456 = vmatprep.subr.bf16.mxu0 %v3955_v47 }
  0x2b   : > { %3496 = vmatprep.subr.bf16.mxu1 %v3956_v48 }
  0x2c   : > { %301 = vmatmul.mubr.bf16.gmra.mrb[4].mxu0 %v3954_v46 }
  0x2d   : > { %472 = vmatmul.mubr.bf16.gmra.mrb[4].mxu1 %v3938_v33  ;;  %3457 = vmatpush3.bf16.msra.mxu0 %v3957_v49 }
  0x2e   : > { %479 = vmatprep.mubr.bf16.mxu1 %v3952_v45  ;;  %3497 = vmatpush3.bf16.msra.mxu1 %v3958_v50 }
  0x2f   : > { %3458 = vmatprep.subr.bf16.mxu0 %v3959_v51  ;;  %3498 = vmatprep.subr.bf16.mxu1 %v3960_v52 }
  0x30   : > { %308 = vmatprep.mubr.bf16.mxu0 %v3963_v55 }
  0x31   : > { %3459 = vmatpush3.bf16.msra.mxu0 %v3961_v53 }
  0x32   : > { %3499 = vmatpush3.bf16.msra.mxu1 %v3962_v54  ;;  %3460 = vmatprep.subr.bf16.mxu0 %v3966_v57 }
  0x33   : > { %3500 = vmatprep.subr.bf16.mxu1 %v3967_v58 }
  0x34   : > { %309 = vmatmul.mubr.bf16.gmra.mrb[8].mxu0 %v3965_v56 }
  0x35   : > { %480 = vmatmul.mubr.bf16.gmra.mrb[8].mxu1 %v3954_v46  ;;  %3461 = vmatpush3.bf16.msra.mxu0 %v3968_v59 }
  0x36   : > { %487 = vmatprep.mubr.bf16.mxu1 %v3963_v55  ;;  %3501 = vmatpush3.bf16.msra.mxu1 %v3969_v60 }
  0x37   : > { %3462 = vmatprep.subr.bf16.mxu0 %v3970_v61  ;;  %3502 = vmatprep.subr.bf16.mxu1 %v3971_v62 }
  0x38   : > { %316 = vmatprep.mubr.bf16.mxu0 %v3974_v2 }
  0x39   : > { %3463 = vmatpush3.bf16.msra.mxu0 %v3972_v63 }
  0x3a   : > { %3503 = vmatpush3.bf16.msra.mxu1 %v3973_v1  ;;  %3464 = vmatprep.subr.bf16.mxu0 %v3977_v4 }
  0x3b   : > { %3504 = vmatprep.subr.bf16.mxu1 %v3978_v5 }
  0x3c   : > { %317 = vmatmul.mubr.bf16.gmra.mrb[12].mxu0 %v3976_v3 }
  0x3d   : > { %488 = vmatmul.mubr.bf16.gmra.mrb[12].mxu1 %v3965_v56  ;;  %3465 = vmatpush3.bf16.msra.mxu0 %v3979_v6 }
  0x3e   : > { %3505 = vmatpush3.bf16.msra.mxu1 %v3980_v7  ;;  %3466 = vmatprep.subr.bf16.mxu0 %v3981_v8 }
  0x3f   : > { %3506 = vmatprep.subr.bf16.mxu1 %v3982_v9  ;;  %709 = vmatprep.mubr.bf16.mxu0 %v3987_v13 }
  0x40   : > { %959 = vmatprep.mubr.bf16.mxu1 %v3990_v15 }
  0x41   : > { %3467 = vmatpush3.bf16.msra.mxu0 %v3983_v10 }
  0x42   : > { %3507 = vmatpush3.bf16.msra.mxu1 %v3984_v11 }
  0x44   : > { %710 = vmatmul.mubr.bf16.vlgmr.msra.gmra.mrb[16].mxu0 %v3985_v12 }
  0x45   : > { %717 = vmatprep.mubr.bf16.mxu0 %v3990_v15  ;;  %960 = vmatmul.mubr.bf16.vlgmr.msra.gmra.mrb[16].mxu1 %v3988_v14 }
  0x46   : > { %967 = vmatprep.mubr.bf16.mxu1 %v3991_v16 }
  0x4c   : > { %718 = vmatmul.mubr.bf16.gmra.mrb[20].mxu0 %v3988_v14 }
  0x4d   : > { %725 = vmatprep.mubr.bf16.mxu0 %v3991_v16  ;;  %968 = vmatmul.mubr.bf16.gmra.mrb[20].mxu1 %v3993_v17 }
  0x4e   : > { %975 = vmatprep.mubr.bf16.mxu1 %v3994_v18 }
  0x54   : > { %726 = vmatmul.mubr.bf16.gmra.mrb[24].mxu0 %v3993_v17 }
  0x55   : > { %733 = vmatprep.mubr.bf16.mxu0 %v3994_v18  ;;  %976 = vmatmul.mubr.bf16.gmra.mrb[24].mxu1 %v3996_v19 }
  0x56   : > { %983 = vmatprep.mubr.bf16.mxu1 %v3997_v20 }
  0x5c   : > { %734 = vmatmul.mubr.bf16.gmra.mrb[28].mxu0 %v3996_v19 }
  0x5d   : > { %984 = vmatmul.mubr.bf16.gmra.mrb[28].mxu1 %v3999_v21 }
  0xf7   : > { %v3388_v22 = vpop.f32.mrb[0].mxu0 }
  0xf8   : > { %v3428_v23 = vpop.f32.mrb[0].mxu1  ;;  %v3389_v24 = vpop.f32.mrb[1].mxu0 }
  0xf9   : > { %v3390_v25 = vadd.f32 %v3389_v24, %v3388_v22  ;;  %v3429_v26 = vpop.f32.mrb[1].mxu1  ;;  %v3391_v27 = vpop.f32.mrb[2].mxu0 }
  0xfa   : > { %v3430_v28 = vadd.f32 %v3429_v26, %v3428_v23  ;;  %v3431_v29 = vpop.f32.mrb[2].mxu1  ;;  %v3392_v30 = vpop.f32.mrb[3].mxu0 }
  0xfb   : > { %v3393_v31 = vadd.f32 %v3392_v30, %v3391_v27  ;;  %v3432_v32 = vpop.f32.mrb[3].mxu1 }
  0xfc   : > { %v466_v33 = vadd.f32 %v3430_v28, %v3390_v25  ;;  %v3433_v34 = vadd.f32 %v3432_v32, %v3431_v29 }
  0xfe   : > { %v469_v35 = vadd.f32 %v3433_v34, %v3393_v31 }
  0xff   : > { %v3394_v37 = vpop.f32.mrb[4].mxu0 }
 0x100   : > { %v3434_v36 = vpop.f32.mrb[4].mxu1  ;;  %v3395_v39 = vpop.f32.mrb[5].mxu0 }
 0x101   : > { %v3435_v38 = vpop.f32.mrb[5].mxu1  ;;  %v3396_v42 = vadd.f32 %v3395_v39, %v3394_v37  ;;  %v3397_v43 = vpop.f32.mrb[6].mxu0 }
 0x102   : > { %v3436_v40 = vadd.f32 %v3435_v38, %v3434_v36  ;;  %v3437_v41 = vpop.f32.mrb[6].mxu1  ;;  %v3398_v45 = vpop.f32.mrb[7].mxu0 }
 0x103   : > { %v3438_v44 = vpop.f32.mrb[7].mxu1  ;;  %v3399_v48 = vadd.f32 %v3398_v45, %v3397_v43 }
 0x104   : > { %v3439_v46 = vadd.f32 %v3438_v44, %v3437_v41  ;;  %v474_v47 = vadd.f32 %v3436_v40, %v3396_v42 }
 0x106   : > { %v4433_v49 = vadd.f32 %v3439_v46, %v3399_v48 }
 0x107   : > { %v3400_v51 = vpop.f32.mrb[8].mxu0 }
 0x108   : > { %v3440_v50 = vpop.f32.mrb[8].mxu1  ;;  %v3401_v53 = vpop.f32.mrb[9].mxu0 }
 0x109   : > { %v3441_v52 = vpop.f32.mrb[9].mxu1  ;;  %v3402_v56 = vadd.f32 %v3401_v53, %v3400_v51  ;;  %v3403_v57 = vpop.f32.mrb[10].mxu0 }
 0x10a   : > { %v3442_v54 = vadd.f32 %v3441_v52, %v3440_v50  ;;  %v3443_v55 = vpop.f32.mrb[10].mxu1  ;;  %v3404_v59 = vpop.f32.mrb[11].mxu0 }
 0x10b   : > { %v3444_v58 = vpop.f32.mrb[11].mxu1  ;;  %v3405_v62 = vadd.f32 %v3404_v59, %v3403_v57 }
 0x10c   : > { %v3445_v60 = vadd.f32 %v3444_v58, %v3443_v55  ;;  %v4435_v61 = vadd.f32 %v3442_v54, %v3402_v56 }
 0x10e   : > { %v4437_v63 = vadd.f32 %v3445_v60, %v3405_v62 }
 0x10f   : > { %v3406_v5 = vpop.f32.mrb[12].mxu0 }
 0x110   : > { %v3446_v1 = vpop.f32.mrb[12].mxu1  ;;  %v3407_v7 = vpop.f32.mrb[13].mxu0 }
 0x111   : > { %v3447_v2 = vpop.f32.mrb[13].mxu1  ;;  %v3408_v9 = vadd.f32 %v3407_v7, %v3406_v5  ;;  %v3409_v10 = vpop.f32.mrb[14].mxu0 }
 0x112   : > { %v3448_v3 = vadd.f32 %v3447_v2, %v3446_v1  ;;  %v3449_v4 = vpop.f32.mrb[14].mxu1  ;;  %v3410_v11 = vpop.f32.mrb[15].mxu0 }
 0x113   : > { %v3450_v6 = vpop.f32.mrb[15].mxu1  ;;  %v3411_v13 = vadd.f32 %v3410_v11, %v3409_v10 }
 0x114   : > { %v3451_v8 = vadd.f32 %v3450_v6, %v3449_v4  ;;  %v4439_v12 = vadd.f32 %v3448_v3, %v3408_v9 }
 0x116   : > { %v4441_v14 = vadd.f32 %v3451_v8, %v3411_v13 }
 0x117   : > { %v3468_v15 = vpop.f32.mrb[16].mxu0 }
 0x118   : > { %v3469_v16 = vpop.f32.mrb[17].mxu0  ;;  %v3508_v17 = vpop.f32.mrb[16].mxu1 }
 0x119   : > { %v3470_v18 = vadd.f32 %v3469_v16, %v3468_v15  ;;  %v3471_v19 = vpop.f32.mrb[18].mxu0  ;;  %v3509_v20 = vpop.f32.mrb[17].mxu1 }
 0x11a   : > { %v3472_v21 = vpop.f32.mrb[19].mxu0  ;;  %v3510_v23 = vadd.f32 %v3509_v20, %v3508_v17  ;;  %v3511_v24 = vpop.f32.mrb[18].mxu1 }
 0x11b   : > { %v742_v22 = vadd.f32 %v3470_v18, %v466_v33  ;;  %v3473_v25 = vadd.f32 %v3472_v21, %v3471_v19  ;;  %v3512_v26 = vpop.f32.mrb[19].mxu1 }
 0x11c   : > { %v3513_v29 = vadd.f32 %v3512_v26, %v3511_v24 }
 0x11d   : > { %v992_v27 = vadd.f32 %v3510_v23, %v742_v22  ;;  %v743_v28 = vadd.f32 %v3473_v25, %v469_v35 }
 0x11f   : > { %v1006_v30 = vadd.f32 %v4208_v0, %v992_v27  ;;  %v993_v31 = vadd.f32 %v3513_v29, %v743_v28  ;;  %v3474_v32 = vpop.f32.mrb[20].mxu0 }
 0x120   : > { %v3475_v34 = vpop.f32.mrb[21].mxu0  ;;  %v3514_v37 = vpop.f32.mrb[20].mxu1 }
 0x121   : > { %v1007_v36 = vadd.f32 %v4208_v0, %v993_v31  ;;  %v3476_v38 = vadd.f32 %v3475_v34, %v3474_v32  ;;  %v3477_v39 = vpop.f32.mrb[22].mxu0  ;;  %v1014_v40 = vmax.f32 %v1006_v30, 0.0  ;;  %v3515_v33 = vpop.f32.mrb[21].mxu1 }
 0x122   : > { %v3478_v41 = vpop.f32.mrb[23].mxu0  ;;  %v3516_v44 = vadd.f32 %v3515_v33, %v3514_v37  ;;  %v3517_v45 = vpop.f32.mrb[22].mxu1 }
 0x123   : > { %v1015_v42 = vmax.f32 %v1007_v36, 0.0  ;;  %v744_v43 = vadd.f32 %v3476_v38, %v474_v47  ;;  %v3479_v35 = vadd.f32 %v3478_v41, %v3477_v39  ;;  %v3518_v46 = vpop.f32.mrb[23].mxu1 }
 0x124   : > { %v3519_v52 = vadd.f32 %v3518_v46, %v3517_v45 }
 0x125   : > { %v1022_v48 = vpack.c.bf16 %v1015_v42, %v1014_v40  ;;  %v994_v50 = vadd.f32 %v3516_v44, %v744_v43  ;;  %v745_v51 = vadd.f32 %v3479_v35, %v4433_v49 }
 0x127   : > { %1029 = vst [vmem:[%s4447_s22] sm:$0xff] %v1022_v48  ;;  %v1008_v53 = vadd.f32 %v4208_v0, %v994_v50  ;;  %v995_v54 = vadd.f32 %v3519_v52, %v745_v51  ;;  %v3480_v55 = vpop.f32.mrb[24].mxu0 }
 0x128   : > { %v3481_v56 = vpop.f32.mrb[25].mxu0  ;;  %v3520_v57 = vpop.f32.mrb[24].mxu1 }
 0x129   : > { %v1009_v47 = vadd.f32 %v4208_v0, %v995_v54  ;;  %v3482_v58 = vadd.f32 %v3481_v56, %v3480_v55  ;;  %v3483_v59 = vpop.f32.mrb[26].mxu0  ;;  %v1016_v60 = vmax.f32 %v1008_v53, 0.0  ;;  %v3521_v62 = vpop.f32.mrb[25].mxu1 }
 0x12a   : > { %v3484_v1 = vpop.f32.mrb[27].mxu0  ;;  %v3522_v3 = vadd.f32 %v3521_v62, %v3520_v57  ;;  %v3523_v4 = vpop.f32.mrb[26].mxu1 }
 0x12b   : > { %v1017_v49 = vmax.f32 %v1009_v47, 0.0  ;;  %v746_v2 = vadd.f32 %v3482_v58, %v4435_v61  ;;  %v3485_v5 = vadd.f32 %v3484_v1, %v3483_v59  ;;  %v3524_v6 = vpop.f32.mrb[27].mxu1 }
 0x12c   : > { %v3525_v10 = vadd.f32 %v3524_v6, %v3523_v4 }
 0x12d   : > { %v1023_v7 = vpack.c.bf16 %v1017_v49, %v1016_v60  ;;  %v996_v8 = vadd.f32 %v3522_v3, %v746_v2  ;;  %v747_v9 = vadd.f32 %v3485_v5, %v4437_v63 }
 0x12f   : > { %1030 = vst [vmem:[%s4447_s22 + $0x8] sm:$0xff] %v1023_v7  ;;  %v1010_v11 = vadd.f32 %v4208_v0, %v996_v8  ;;  %v997_v13 = vadd.f32 %v3525_v10, %v747_v9  ;;  %v3486_v15 = vpop.f32.mrb[28].mxu0 }
 0x130   : > { %v3487_v16 = vpop.f32.mrb[29].mxu0  ;;  %v3526_v18 = vpop.f32.mrb[28].mxu1 }
 0x131   : > { %v1011_v17 = vadd.f32 %v4208_v0, %v997_v13  ;;  %v3488_v61 = vadd.f32 %v3487_v16, %v3486_v15  ;;  %v3489_v19 = vpop.f32.mrb[30].mxu0  ;;  %v1018_v20 = vmax.f32 %v1010_v11, 0.0  ;;  %v3527_v21 = vpop.f32.mrb[29].mxu1 }
 0x132   : > { %v3490_v22 = vpop.f32.mrb[31].mxu0  ;;  %v3528_v63 = vadd.f32 %v3527_v21, %v3526_v18  ;;  %v3529_v25 = vpop.f32.mrb[30].mxu1 }
 0x133   : > { %v1019_v23 = vmax.f32 %v1011_v17, 0.0  ;;  %v748_v24 = vadd.f32 %v3488_v61, %v4439_v12  ;;  %v3491_v26 = vadd.f32 %v3490_v22, %v3489_v19  ;;  %v3530_v27 = vpop.f32.mrb[31].mxu1  ;;  %v4469_v12 = vld [vmem:[%s4989_s4] ss:$0 sm:$0xff] (%p42_p0) }
 0x134   : > { %v3531_v31 = vadd.f32 %v3530_v27, %v3529_v25 }
 0x135   : > { %v1024_v28 = vpack.c.bf16 %v1019_v23, %v1018_v20  ;;  %v998_v29 = vadd.f32 %v3528_v63, %v748_v24  ;;  %v749_v30 = vadd.f32 %v3491_v26, %v4441_v14 }
 0x137   : > { %1031 = vst [vmem:[%s4447_s22 + $0x10] sm:$0xff] %v1024_v28  ;;  %v1012_v32 = vadd.f32 %v4208_v0, %v998_v29  ;;  %v999_v34 = vadd.f32 %v3531_v31, %v749_v30 }
 0x139   : > { %v1013_v36 = vadd.f32 %v4208_v0, %v999_v34  ;;  %v1020_v37 = vmax.f32 %v1012_v32, 0.0  ;;  %44 = sbr.rel (!%p42_p0) target bundleno = 2 (0x2), region = 100 }
 0x13b   : > { %v1021_v38 = vmax.f32 %v1013_v36, 0.0 }
 0x13d   : > { %v1025_v39 = vpack.c.bf16 %v1021_v38, %v1020_v37 }
 0x13f   : > { %1032 = vst [vmem:[%s4447_s22 + $0x18] sm:$0xff] %v1025_v39 }
 0x140 LB: > { %v4000_v14 = vld [vmem:[%s4988_s3 + $0x40] sm:$0xff]   ;;  %v4140_v40 = vmov 0.0   ;;  %v4002_v33 = vld [vmem:[%s4988_s3 + $0x48] sm:$0xff]   ;;  %vm4141_vm0 = vmmov 0   ;;  %v4004_v42 = vld [vmem:[%s4988_s3 + $0x50] sm:$0xff]   ;;  %s3370_s4 = sshll.u32 %s4138_s25, 5  ;;  %s4138_s25 = sphi %s4471_s25, %s1039_s25  }
 0x141   : > { %3665 = vmatprep.subr.bf16.mxu0 %v4140_v40  ;;  %3693 = vmatprep.subr.bf16.mxu1 %v4140_v40  ;;  %v4001_v0 = vld [vmem:[%s4988_s3] sm:$0xff]   ;;  %v4003_v41 = vld [vmem:[%s4988_s3 + $0x8] sm:$0xff]   ;;  %v4005_v43 = vld [vmem:[%s4988_s3 + $0x10] sm:$0xff]   ;;  %s4545_s14 = scalar_lea.vmem [#allocation2], %s3370_s4  ;;  %vm1580_vm1 = vcmask 523264  }
 0x142   : > { %3666 = vmatpush3.bf16.msra.mxu0 %v4000_v14  ;;  %3681 = vmatprep.mubr.msk.bf16.mxu0 %vm4141_vm0, %v4140_v40  ;;  %v4006_v44 = vld [vmem:[%s4988_s3 + $0x58] sm:$0xff]   ;;  %v4008_v35 = vld [vmem:[%s4988_s3 + $0x60] sm:$0xff]   ;;  %v4010_v48 = vld [vmem:[%s4988_s3 + $0x68] sm:$0xff]  }
 0x143   : > { %3694 = vmatpush3.bf16.msra.mxu1 %v4001_v0  ;;  %3667 = vmatprep.subr.bf16.mxu0 %v4140_v40  ;;  %v4007_v45 = vld [vmem:[%s4988_s3 + $0x18] sm:$0xff]   ;;  %v4009_v46 = vld [vmem:[%s4988_s3 + $0x20] sm:$0xff]   ;;  %v4011_v50 = vld [vmem:[%s4988_s3 + $0x28] sm:$0xff]  }
 0x144   : > { %3695 = vmatprep.subr.bf16.mxu1 %v4140_v40  ;;  %3709 = vmatprep.mubr.msk.bf16.mxu1 %vm4141_vm0, %v4140_v40  ;;  %v4012_v51 = vld [vmem:[%s4988_s3 + $0x70] sm:$0xff]   ;;  %v4014_v53 = vld [vmem:[%s4988_s3 + $0x78] sm:$0xff]   ;;  %v4016_v47 = vld [vmem:[%s4988_s3 + $0x80] sm:$0xff]  }
 0x145   : > { %v4013_v52 = vld [vmem:[%s4988_s3 + $0x30] sm:$0xff]   ;;  %v4015_v54 = vld [vmem:[%s4988_s3 + $0x38] sm:$0xff]   ;;  %v4017_v57 = vld [vmem:[%s4988_s3 + $0xc0] sm:$0xff]  }
 0x146   : > { %3668 = vmatpush3.bf16.msra.mxu0 %v4002_v33  ;;  %v1044_v55 = vld [vmem:[%s4545_s14 + $0x8] sm:$0xff]  ;;  %v1043_v56 = vld [vmem:[%s4545_s14] sm:$0xff]  ;;  %v4020_v60 = vld [vmem:[%s4988_s3 + $0x90] sm:$0xff]  }
 0x147   : > { %3696 = vmatpush3.bf16.msra.mxu1 %v4003_v41  ;;  %3669 = vmatprep.subr.bf16.mxu0 %v4140_v40  ;;  %v4018_v58 = vld [vmem:[%s4988_s3 + $0x88] sm:$0xff]   ;;  %v1045_v62 = vld [vmem:[%s4545_s14 + $0x10] sm:$0xff]  ;;  %v4022_v49 = vld [vmem:[%s4988_s3 + $0x98] sm:$0xff]  }
 0x148   : > { %3697 = vmatprep.subr.bf16.mxu1 %v4140_v40  ;;  %v4019_v59 = vld [vmem:[%s4988_s3 + $0xc8] sm:$0xff]   ;;  %v4021_v1 = vld [vmem:[%s4988_s3 + $0xd0] sm:$0xff]   ;;  %v4023_v2 = vld [vmem:[%s4988_s3 + $0xd8] sm:$0xff]  }
 0x149   : > { %v4024_v3 = vld [vmem:[%s4988_s3 + $0xa0] sm:$0xff]   ;;  %v1062_v4 = vld [vmem:[%s4545_s14 + $0x18] sm:$0xff]  ;;  %v4026_v6 = vld [vmem:[%s4988_s3 + $0xa8] sm:$0xff]  }
 0x14a   : > { %3670 = vmatpush3.bf16.msra.mxu0 %v4004_v42  ;;  %v4025_v5 = vld [vmem:[%s4988_s3 + $0xe0] sm:$0xff]   ;;  %v4027_v7 = vld [vmem:[%s4988_s3 + $0xe8] sm:$0xff]   ;;  %v4028_v8 = vld [vmem:[%s4988_s3 + $0xb0] sm:$0xff]  }
 0x14b   : > { %3698 = vmatpush3.bf16.msra.mxu1 %v4005_v43  ;;  %3671 = vmatprep.subr.bf16.mxu0 %v4140_v40  ;;  %v4029_v9 = vld [vmem:[%s4988_s3 + $0xf0] sm:$0xff]   ;;  %v4030_v10 = vld [vmem:[%s4988_s3 + $0xb8] sm:$0xff]   ;;  %v3151_v13 = vld [vmem:[%s4545_s14 + $0x20] sm:$0xff] }
 0x14c   : > { %3699 = vmatprep.subr.bf16.mxu1 %v4140_v40  ;;  %v4031_v11 = vld [vmem:[%s4988_s3 + $0xf8] sm:$0xff]   ;;  %v3178_v15 = vld [vmem:[%s4545_s14 + $0x28] sm:$0xff]  ;;  %v3179_v16 = vld [vmem:[%s4545_s14 + $0x30] sm:$0xff] }
 0x14d   : > { %v3180_v17 = vld [vmem:[%s4545_s14 + $0x38] sm:$0xff]  ;;  %s3371_s14 = smul.u32 24, %s4138_s25  ;;  %s1039_s25 = sadd.s32 1, %s4138_s25  }
 0x14e   : > { %3672 = vmatpush3.bf16.msra.mxu0 %v4006_v44  ;;  %p1036_p1 = scmp.ge.s32.totalorder %s1039_s25, 3  }
 0x14f   : > { %3700 = vmatpush3.bf16.msra.mxu1 %v4007_v45  ;;  %3673 = vmatprep.subr.bf16.mxu0 %v4140_v40  ;;  %s1579_s27 = scalar_lea.vmem [#allocation3], %s3371_s14  ;;  %vm4143_vm2 = vmmov (%p1036_p1), 0  }
 0x150   : > { %3701 = vmatprep.subr.bf16.mxu1 %v4140_v40 }
 0x152   : > { %3674 = vmatpush3.bf16.msra.mxu0 %v4008_v35 }
 0x153   : > { %3702 = vmatpush3.bf16.msra.mxu1 %v4009_v46  ;;  %3675 = vmatprep.subr.bf16.mxu0 %v4140_v40 }
 0x154   : > { %3703 = vmatprep.subr.bf16.mxu1 %v4140_v40 }
 0x156   : > { %3676 = vmatpush3.bf16.msra.mxu0 %v4010_v48 }
 0x157   : > { %3704 = vmatpush3.bf16.msra.mxu1 %v4011_v50  ;;  %3677 = vmatprep.subr.bf16.mxu0 %v4140_v40 }
 0x158   : > { %3705 = vmatprep.subr.bf16.mxu1 %v4140_v40 }
 0x15a   : > { %3678 = vmatpush3.bf16.msra.mxu0 %v4012_v51 }
 0x15b   : > { %3706 = vmatpush3.bf16.msra.mxu1 %v4013_v52  ;;  %3679 = vmatprep.subr.bf16.mxu0 %v4140_v40 }
 0x15c   : > { %3707 = vmatprep.subr.bf16.mxu1 %v4140_v40 }
 0x15e   : > { %3680 = vmatpush3.bf16.msra.mxu0 %v4014_v53 }
 0x15f   : > { %3708 = vmatpush3.bf16.msra.mxu1 %v4015_v54  ;;  %3721 = vmatprep.subr.bf16.mxu0 %v4140_v40 }
 0x160   : > { %3749 = vmatprep.subr.bf16.mxu1 %v4140_v40 }
 0x161   : > { %3682 = vmatmul.mubr.bf16.vlgmr.msra.gmra.mrb[0].mxu0 %v1044_v55 }
 0x162   : > { %3710 = vmatmul.mubr.bf16.vlgmr.msra.gmra.mrb[0].mxu1 %v1043_v56  ;;  %3722 = vmatpush3.bf16.msra.mxu0 %v4016_v47 }
 0x163   : > { %3750 = vmatpush3.bf16.msra.mxu1 %v4017_v57  ;;  %3723 = vmatprep.subr.bf16.mxu0 %v4140_v40 }
 0x164   : > { %3751 = vmatprep.subr.bf16.mxu1 %v4140_v40  ;;  %3685 = vmatprep.mubr.msk.bf16.mxu0 %vm4141_vm0, %v4140_v40 }
 0x165   : > { %3713 = vmatprep.mubr.msk.bf16.mxu1 %vm4141_vm0, %v4140_v40 }
 0x166   : > { %3724 = vmatpush3.bf16.msra.mxu0 %v4018_v58 }
 0x167   : > { %3752 = vmatpush3.bf16.msra.mxu1 %v4019_v59  ;;  %3725 = vmatprep.subr.bf16.mxu0 %v4140_v40 }
 0x168   : > { %3753 = vmatprep.subr.bf16.mxu1 %v4140_v40 }
 0x169   : > { %3686 = vmatmul.mubr.bf16.gmra.mrb[4].mxu0 %v1045_v62 }
 0x16a   : > { %3726 = vmatpush3.bf16.msra.mxu0 %v4020_v60  ;;  %3714 = vmatmul.mubr.bf16.gmra.mrb[4].mxu1 %v1044_v55 }
 0x16b   : > { %3754 = vmatpush3.bf16.msra.mxu1 %v4021_v1  ;;  %3727 = vmatprep.subr.bf16.mxu0 %v4140_v40 }
 0x16c   : > { %3755 = vmatprep.subr.bf16.mxu1 %v4140_v40  ;;  %3689 = vmatprep.mubr.msk.bf16.mxu0 %vm4141_vm0, %v4140_v40 }
 0x16d   : > { %3717 = vmatprep.mubr.msk.bf16.mxu1 %vm4141_vm0, %v4140_v40 }
 0x16e   : > { %3728 = vmatpush3.bf16.msra.mxu0 %v4022_v49 }
 0x16f   : > { %3756 = vmatpush3.bf16.msra.mxu1 %v4023_v2  ;;  %3729 = vmatprep.subr.bf16.mxu0 %v4140_v40 }
 0x170   : > { %3757 = vmatprep.subr.bf16.mxu1 %v4140_v40 }
 0x171   : > { %3690 = vmatmul.mubr.bf16.gmra.mrb[8].mxu0 %v1062_v4 }
 0x172   : > { %3730 = vmatpush3.bf16.msra.mxu0 %v4024_v3  ;;  %3718 = vmatmul.mubr.bf16.gmra.mrb[8].mxu1 %v1045_v62 }
 0x173   : > { %3758 = vmatpush3.bf16.msra.mxu1 %v4025_v5  ;;  %3731 = vmatprep.subr.bf16.mxu0 %v4140_v40 }
 0x174   : > { %3759 = vmatprep.subr.bf16.mxu1 %v4140_v40  ;;  %3737 = vmatprep.mubr.msk.bf16.mxu0 %vm4141_vm0, %v4140_v40 }
 0x175   : > { %3765 = vmatprep.mubr.msk.bf16.mxu1 %vm4141_vm0, %v4140_v40 }
 0x176   : > { %3732 = vmatpush3.bf16.msra.mxu0 %v4026_v6 }
 0x177   : > { %3760 = vmatpush3.bf16.msra.mxu1 %v4027_v7  ;;  %3733 = vmatprep.subr.bf16.mxu0 %v4140_v40 }
 0x178   : > { %3761 = vmatprep.subr.bf16.mxu1 %v4140_v40 }
 0x17a   : > { %3734 = vmatpush3.bf16.msra.mxu0 %v4028_v8 }
 0x17b   : > { %3762 = vmatpush3.bf16.msra.mxu1 %v4029_v9  ;;  %3735 = vmatprep.subr.bf16.mxu0 %v4140_v40 }
 0x17c   : > { %3763 = vmatprep.subr.bf16.mxu1 %v4140_v40 }
 0x17e   : > { %3736 = vmatpush3.bf16.msra.mxu0 %v4030_v10 }
 0x17f   : > { %3764 = vmatpush3.bf16.msra.mxu1 %v4031_v11 }
 0x181   : > { %3738 = vmatmul.mubr.bf16.vlgmr.msra.gmra.mrb[12].mxu0 %v3151_v13 }
 0x182   : > { %3766 = vmatmul.mubr.bf16.vlgmr.msra.gmra.mrb[12].mxu1 %v3178_v15  ;;  %3741 = vmatprep.mubr.msk.bf16.mxu0 %vm4141_vm0, %v4140_v40 }
 0x183   : > { %3769 = vmatprep.mubr.msk.bf16.mxu1 %vm4141_vm0, %v4140_v40 }
 0x189   : > { %3742 = vmatmul.mubr.bf16.gmra.mrb[16].mxu0 %v3178_v15 }
 0x18a   : > { %3770 = vmatmul.mubr.bf16.gmra.mrb[16].mxu1 %v3179_v16  ;;  %3745 = vmatprep.mubr.msk.bf16.mxu0 %vm4141_vm0, %v4140_v40 }
 0x18b   : > { %3773 = vmatprep.mubr.msk.bf16.mxu1 %vm4141_vm0, %v4140_v40 }
 0x191   : > { %3746 = vmatmul.mubr.bf16.gmra.mrb[20].mxu0 %v3179_v16 }
 0x192   : > { %3774 = vmatmul.mubr.bf16.gmra.mrb[20].mxu1 %v3180_v17 }
 0x234   : > { %v1162_v18 = vpop.f32.mrb[0].mxu0 }
 0x235   : > { %v1267_v61 = vpop.f32.mrb[0].mxu1  ;;  %v3683_v19 = vpop.f32.mrb[1].mxu0 }
 0x236   : > { %v1268_v20 = vadd.f32 %v1267_v61, %v1162_v18  ;;  %v3711_v21 = vpop.f32.mrb[1].mxu1  ;;  %v1165_v22 = vpop.f32.mrb[2].mxu0 }
 0x237   : > { %v1270_v23 = vpop.f32.mrb[2].mxu1  ;;  %v3684_v24 = vpop.f32.mrb[3].mxu0 }
 0x238   : > { %v1271_v63 = vadd.f32 %v1270_v23, %v1165_v22  ;;  %v3712_v25 = vpop.f32.mrb[3].mxu1 }
 0x23c   : > { %v1170_v26 = vpop.f32.mrb[4].mxu0 }
 0x23d   : > { %v3687_v27 = vpop.f32.mrb[5].mxu0  ;;  %v1275_v28 = vpop.f32.mrb[4].mxu1 }
 0x23e   : > { %v1276_v29 = vadd.f32 %v1275_v28, %v1170_v26  ;;  %v1173_v30 = vpop.f32.mrb[6].mxu0  ;;  %v3715_v31 = vpop.f32.mrb[5].mxu1 }
 0x23f   : > { %v3688_v32 = vpop.f32.mrb[7].mxu0  ;;  %v1278_v34 = vpop.f32.mrb[6].mxu1 }
 0x240   : > { %v1279_v36 = vadd.f32 %v1278_v34, %v1173_v30  ;;  %v3716_v37 = vpop.f32.mrb[7].mxu1 }
 0x241   :  { %v4142_v37 = vmov (%p1036_p1), 0.0  }
 0x242   :  { %3777 = vmatprep.subr.bf16.mxu0 (%p1036_p1), %v4142_v37  ;;  %3789 = vmatprep.subr.bf16.mxu1 (%p1036_p1), %v4142_v37 }
 0x243   :  { %3785 = vmatprep.mubr.msk.bf16.mxu0 (%p1036_p1), %vm4143_vm2, %v4142_v37  ;;  %3797 = vmatprep.mubr.msk.bf16.mxu1 (%p1036_p1), %vm4143_vm2, %v4142_v37 }
 0x244   : > { %v1178_v38 = vpop.f32.mrb[8].mxu0 }
 0x245   : > { %v3691_v39 = vpop.f32.mrb[9].mxu0  ;;  %v1283_v14 = vpop.f32.mrb[8].mxu1 }
 0x246   : > { %v1284_v40 = vadd.f32 %v1283_v14, %v1178_v38  ;;  %v1181_v0 = vpop.f32.mrb[10].mxu0  ;;  %v3719_v33 = vpop.f32.mrb[9].mxu1  ;;  %v4033_v38 = vld [vmem:[%s4990_s5] sm:$0xff] (%p1036_p1)   ;;  %v4034_v39 = vld [vmem:[%s4990_s5 + $0x28] sm:$0xff] (%p1036_p1)   ;;  %v4036_v14 = vld [vmem:[%s4990_s5 + $0x30] sm:$0xff] (%p1036_p1)  }
 0x247   : > { %v3692_v41 = vpop.f32.mrb[11].mxu0  ;;  %v1286_v42 = vpop.f32.mrb[10].mxu1  ;;  %3790 = vmatpush3.bf16.msra.mxu1 (%p1036_p1), %v4033_v38  ;;  %v4039_v33 = vld [vmem:[%s4990_s5 + $0x18] sm:$0xff] (%p1036_p1)  }
 0x248   : > { %v1287_v43 = vadd.f32 %v1286_v42, %v1181_v0  ;;  %v3720_v44 = vpop.f32.mrb[11].mxu1  ;;  %3791 = vmatprep.subr.bf16.mxu1 (%p1036_p1), %v4142_v37  ;;  %v4038_v0 = vld [vmem:[%s4990_s5 + $0x38] sm:$0xff] (%p1036_p1)  }
 0x249   :  { %v4041_v44 = vld [vmem:[%s4990_s5 + $0x60] sm:$0xff] (%p1036_p1)  }
 0x254   : > { %v1396_v45 = vpop.f32.mrb[12].mxu0 }
 0x255   : > { %v1419_v35 = vadd.f32 %v1396_v45, %v1268_v20  ;;  %v1527_v46 = vpop.f32.mrb[12].mxu1  ;;  %v3739_v48 = vpop.f32.mrb[13].mxu0  ;;  %v4042_v45 = vld [vmem:[%s4990_s5 + $0x48] sm:$0xff] (%p1036_p1)  }
 0x256   : > { %v3767_v50 = vpop.f32.mrb[13].mxu1  ;;  %v1399_v51 = vpop.f32.mrb[14].mxu0  ;;  %v4045_v48 = vld [vmem:[%s4990_s5 + $0x70] sm:$0xff] (%p1036_p1)  }
 0x257   : > { %v1550_v52 = vadd.f32 %v1527_v46, %v1419_v35  ;;  %v1420_v53 = vadd.f32 %v1399_v51, %v1271_v63  ;;  %v1530_v54 = vpop.f32.mrb[14].mxu1  ;;  %v3740_v55 = vpop.f32.mrb[15].mxu0  ;;  %v4043_v35 = vld [vmem:[%s4990_s5 + $0x68] sm:$0xff] (%p1036_p1)   ;;  %v4044_v46 = vld [vmem:[%s4990_s5 + $0x50] sm:$0xff] (%p1036_p1)   ;;  %v4046_v50 = vld [vmem:[%s4990_s5 + $0x58] sm:$0xff] (%p1036_p1)  }
 0x258   : > { %v3768_v56 = vpop.f32.mrb[15].mxu1  ;;  %v4047_v51 = vld [vmem:[%s4990_s5 + $0x78] sm:$0xff] (%p1036_p1)   ;;  %v4049_v55 = vld [vmem:[%s4990_s5 + $0xa0] sm:$0xff] (%p1036_p1)  }
 0x259   : > { %v1562_v47 = vadd.f32 %v4469_v12, %v1550_v52  ;;  %v1551_v57 = vadd.f32 %v1530_v54, %v1420_v53  ;;  %v4048_v53 = vld [vmem:[%s4990_s5 + $0x80] sm:$0xff] (%p1036_p1)   ;;  %v4050_v56 = vld [vmem:[%s4990_s5 + $0x88] sm:$0xff] (%p1036_p1)  }
 0x25b   : > { %v1563_v58 = vadd.f32 %v4469_v12, %v1551_v57  ;;  %v1568_v60 = vmax.f32 %v1562_v47, 0.0  ;;  %v4051_v47 = vld [vmem:[%s4990_s5 + $0xa8] sm:$0xff] (%p1036_p1)   ;;  %v4052_v57 = vld [vmem:[%s4990_s5 + $0x90] sm:$0xff] (%p1036_p1)  }
 0x25c   : > { %v1404_v59 = vpop.f32.mrb[16].mxu0 }
 0x25d   : > { %v1569_v62 = vmax.f32 %v1563_v58, 0.0  ;;  %v1421_v1 = vadd.f32 %v1404_v59, %v1276_v29  ;;  %v1535_v49 = vpop.f32.mrb[16].mxu1  ;;  %v3743_v2 = vpop.f32.mrb[17].mxu0  ;;  %v4053_v58 = vld [vmem:[%s4990_s5 + $0xb0] sm:$0xff] (%p1036_p1)   ;;  %v4054_v59 = vld [vmem:[%s4990_s5 + $0x98] sm:$0xff] (%p1036_p1)  }
 0x25e   : > { %v3771_v3 = vpop.f32.mrb[17].mxu1  ;;  %v1407_v4 = vpop.f32.mrb[18].mxu0  ;;  %v4057_v2 = vld [vmem:[%s4990_s5 + $0xe0] sm:$0xff] (%p1036_p1)  }
 0x25f   : > { %v1574_v5 = vpack.c.bf16 %v1569_v62, %v1568_v60  ;;  %v1552_v6 = vadd.f32 %v1535_v49, %v1421_v1  ;;  %v1422_v7 = vadd.f32 %v1407_v4, %v1279_v36  ;;  %v1538_v8 = vpop.f32.mrb[18].mxu1  ;;  %v3744_v9 = vpop.f32.mrb[19].mxu0  ;;  %v4032_v36 = vld [vmem:[%s4990_s5 + $0x20] sm:$0xff] (%p1036_p1)   ;;  %v4055_v60 = vld [vmem:[%s4990_s5 + $0xb8] sm:$0xff] (%p1036_p1)   ;;  %v4058_v3 = vld [vmem:[%s4990_s5 + $0xc8] sm:$0xff] (%p1036_p1)  }
 0x260   : > { %v3772_v10 = vpop.f32.mrb[19].mxu1  ;;  %3778 = vmatpush3.bf16.msra.mxu0 (%p1036_p1), %v4032_v36  ;;  %v4056_v1 = vld [vmem:[%s4990_s5 + $0xc0] sm:$0xff] (%p1036_p1)   ;;  %v4059_v4 = vld [vmem:[%s4990_s5 + $0xe8] sm:$0xff] (%p1036_p1)  }
 0x261   : > { %1581 = vst.msk [vmem:[%s1579_s27] sm:$0xff] %vm1580_vm1, %v1574_v5  ;;  %v1564_v11 = vadd.f32 %v4469_v12, %v1552_v6  ;;  %v1553_v13 = vadd.f32 %v1538_v8, %v1422_v7  ;;  %3779 = vmatprep.subr.bf16.mxu0 (%p1036_p1), %v4142_v37  ;;  %v4060_v5 = vld [vmem:[%s4990_s5 + $0xd0] sm:$0xff] (%p1036_p1)   ;;  %v4062_v7 = vld [vmem:[%s4990_s5 + $0xd8] sm:$0xff] (%p1036_p1)   ;;  %v4064_v10 = vld [vmem:[%s4990_s5 + $0x100] sm:$0xff] (%p1036_p1)  }
 0x262   :  { %v4061_v6 = vld [vmem:[%s4990_s5 + $0xf0] sm:$0xff] (%p1036_p1)   ;;  %v4063_v8 = vld [vmem:[%s4990_s5 + $0xf8] sm:$0xff] (%p1036_p1)   ;;  %v4093_v36 = vld [vmem:[%s4994_s9 + $0xc0] sm:$0xff] (%p1036_p1)  }
 0x263   : > { %v1565_v15 = vadd.f32 %v4469_v12, %v1553_v13  ;;  %v1570_v17 = vmax.f32 %v1564_v11, 0.0  ;;  %v4065_v13 = vld [vmem:[%s4990_s5 + $0x108] sm:$0xff] (%p1036_p1)  }
 0x264   : > { %v1412_v16 = vpop.f32.mrb[20].mxu0  ;;  %3780 = vmatpush3.bf16.msra.mxu0 (%p1036_p1), %v4034_v39 }
 0x265   : > { %v1571_v18 = vmax.f32 %v1565_v15, 0.0  ;;  %v1423_v61 = vadd.f32 %v1412_v16, %v1284_v40  ;;  %v1543_v19 = vpop.f32.mrb[20].mxu1  ;;  %v3747_v20 = vpop.f32.mrb[21].mxu0  ;;  %3781 = vmatprep.subr.bf16.mxu0 (%p1036_p1), %v4142_v37  ;;  %v4037_v40 = vld [vmem:[%s4990_s5 + $0x10] sm:$0xff] (%p1036_p1)   ;;  %v4067_v16 = vld [vmem:[%s4990_s5 + $0x118] sm:$0xff] (%p1036_p1)  }
 0x266   : > { %v3775_v21 = vpop.f32.mrb[21].mxu1  ;;  %v1415_v22 = vpop.f32.mrb[22].mxu0  ;;  %v4066_v15 = vld [vmem:[%s4990_s5 + $0x110] sm:$0xff] (%p1036_p1)   ;;  %v4071_v20 = vld [vmem:[%s4992_s7 + $0x8] ss:$16 sps:$4 sm:$0xff] (%p1036_p1)  }
 0x267   : > { %v1575_v23 = vpack.c.bf16 %v1571_v18, %v1570_v17  ;;  %v1554_v24 = vadd.f32 %v1543_v19, %v1423_v61  ;;  %v1424_v63 = vadd.f32 %v1415_v22, %v1287_v43  ;;  %v1546_v25 = vpop.f32.mrb[22].mxu1  ;;  %v3748_v26 = vpop.f32.mrb[23].mxu0  ;;  %v4040_v43 = vld [vmem:[%s4990_s5 + $0x40] sm:$0xff] (%p1036_p1)   ;;  %v4073_v61 = vld [vmem:[%s4992_s7 + $0xc] ss:$16 sps:$4 sm:$0xff] (%p1036_p1)  }
 0x268   : > { %v3776_v27 = vpop.f32.mrb[23].mxu1  ;;  %3782 = vmatpush3.bf16.msra.mxu0 (%p1036_p1), %v4036_v14  ;;  %v4070_v18 = vld [vmem:[%s4992_s7 + $0x4] ss:$16 sps:$4 sm:$0xff] (%p1036_p1)   ;;  %v4068_v19 = vld [vmem:[%s4992_s7] ss:$16 sps:$4 sm:$0xff] (%p1036_p1)  }
 0x269   : > { %1582 = vst.msk [vmem:[%s1579_s27 + $0x8] sm:$0xff] %vm1580_vm1, %v1575_v23  ;;  %v1566_v28 = vadd.f32 %v4469_v12, %v1554_v24  ;;  %v1555_v29 = vadd.f32 %v1546_v25, %v1424_v63  ;;  %3783 = vmatprep.subr.bf16.mxu0 (%p1036_p1), %v4142_v37  ;;  %v4076_v21 = vld [vmem:[%s4992_s7 + $0x24] ss:$16 sps:$4 sm:$0xff] (%p1036_p1)   ;;  %v4079_v22 = vld [vmem:[%s4992_s7 + $0x2c] ss:$16 sps:$4 sm:$0xff] (%p1036_p1)  }
 0x26a   :  { %v4074_v23 = vld [vmem:[%s4992_s7 + $0x20] ss:$16 sps:$4 sm:$0xff] (%p1036_p1)   ;;  %v4077_v24 = vld [vmem:[%s4992_s7 + $0x28] ss:$16 sps:$4 sm:$0xff] (%p1036_p1)   ;;  %v4082_v63 = vld [vmem:[%s4992_s7 + $0x44] ss:$16 sps:$4 sm:$0xff] (%p1036_p1)  }
 0x26b   : > { %v1567_v30 = vadd.f32 %v4469_v12, %v1555_v29  ;;  %v1572_v31 = vmax.f32 %v1566_v28, 0.0  ;;  %1038 = sbr.rel (!%p1036_p1) target bundleno = 320 (0x140), region = 111  ;;  %v4035_v12 = vld [vmem:[%s4990_s5 + $0x8] sm:$0xff] (%p1036_p1)   ;;  %v4080_v26 = vld [vmem:[%s4992_s7 + $0x40] ss:$16 sps:$4 sm:$0xff] (%p1036_p1)  }
 0x26c   :  { %3792 = vmatpush3.bf16.msra.mxu1 (%p1036_p1), %v4035_v12  ;;  %3784 = vmatpush3.bf16.msra.mxu0 (%p1036_p1), %v4038_v0  ;;  %v4085_v25 = vld [vmem:[%s4992_s7 + $0x4c] ss:$16 sps:$4 sm:$0xff] (%p1036_p1)   ;;  %v4083_v27 = vld [vmem:[%s4992_s7 + $0x48] ss:$16 sps:$4 sm:$0xff] (%p1036_p1)   ;;  %v4088_v28 = vld [vmem:[%s4992_s7 + $0x64] ss:$16 sps:$4 sm:$0xff] (%p1036_p1)  }
 0x26d   : > { %v1573_v32 = vmax.f32 %v1567_v30, 0.0  ;;  %3793 = vmatprep.subr.bf16.mxu1 (%p1036_p1), %v4142_v37  ;;  %3801 = vmatprep.subr.bf16.mxu0 (%p1036_p1), %v4142_v37  ;;  %v4091_v29 = vld [vmem:[%s4992_s7 + $0x6c] ss:$16 sps:$4 sm:$0xff] (%p1036_p1)   ;;  %v4086_v30 = vld [vmem:[%s4992_s7 + $0x60] ss:$16 sps:$4 sm:$0xff] (%p1036_p1)  }
 0x26f   : > { %v1576_v34 = vpack.c.bf16 %v1573_v32, %v1572_v31  ;;  %v4089_v31 = vld [vmem:[%s4992_s7 + $0x68] ss:$16 sps:$4 sm:$0xff] (%p1036_p1)   ;;  %v4144_v32 = vmov (%p1036_p1), 0  }
 0x270   :  { %3794 = vmatpush3.bf16.msra.mxu1 (%p1036_p1), %v4037_v40 }
 0x271   : > { %1583 = vst.msk [vmem:[%s1579_s27 + $0x10] sm:$0xff] %vm1580_vm1, %v1576_v34  ;;  %3795 = vmatprep.subr.bf16.mxu1 (%p1036_p1), %v4142_v37  ;;  %v4092_v34 = vld [vmem:[%s4994_s9 + $0x40] sm:$0xff] (%p1036_p1)  }
 0x274   :  { %3796 = vmatpush3.bf16.msra.mxu1 %v4039_v33 }
 0x275   :  { %3813 = vmatprep.subr.bf16.mxu1 %v4142_v37 }
 0x278   :  { %v1594_v41 = vld [vmem:[#allocation3 + $0x8] sm:$0xff]  ;;  %v1585_v42 = vld [vmem:[#allocation3] sm:$0xff]  ;;  %v1741_v52 = vld [vmem:[#allocation3 + $0x10] sm:$0xff] }
 0x279   :  { %3786 = vmatmul.mubr.msk.bf16.vlgmr.msra.gmra.mrb[0].mxu0 %vm1580_vm1, %v1594_v41  ;;  %3798 = vmatmul.mubr.msk.bf16.vlgmr.msra.gmra.mrb[0].mxu1 %vm1580_vm1, %v1585_v42  ;;  %v1822_v54 = vld [vmem:[#allocation3 + $0x18] sm:$0xff]  ;;  %v1902_v62 = vld [vmem:[#allocation3 + $0x20] sm:$0xff]  ;;  %v1982_v49 = vld [vmem:[#allocation3 + $0x28] sm:$0xff] }
 0x27a   :  { %3802 = vmatpush3.bf16.msra.mxu0 %v4040_v43  ;;  %3814 = vmatpush3.bf16.msra.mxu1 %v4041_v44  ;;  %v2063_v9 = vld [vmem:[#allocation3 + $0x30] sm:$0xff]  ;;  %v2143_v11 = vld [vmem:[#allocation3 + $0x38] sm:$0xff]  ;;  %v2223_v17 = vld [vmem:[#allocation3 + $0x40] sm:$0xff] }
 0x27b   :  { %3803 = vmatprep.subr.bf16.mxu0 %v4142_v37  ;;  %3815 = vmatprep.subr.bf16.mxu1 %v4142_v37 }
 0x27c   :  { %3809 = vmatprep.mubr.msk.bf16.mxu0 %vm4143_vm2, %v4142_v37  ;;  %3821 = vmatprep.mubr.msk.bf16.mxu1 %vm4143_vm2, %v4142_v37 }
 0x27e   :  { %3804 = vmatpush3.bf16.msra.mxu0 %v4042_v45  ;;  %3816 = vmatpush3.bf16.msra.mxu1 %v4043_v35 }
 0x27f   :  { %3805 = vmatprep.subr.bf16.mxu0 %v4142_v37  ;;  %3817 = vmatprep.subr.bf16.mxu1 %v4142_v37 }
 0x282   :  { %3806 = vmatpush3.bf16.msra.mxu0 %v4044_v46  ;;  %3818 = vmatpush3.bf16.msra.mxu1 %v4045_v48 }
 0x283   :  { %3807 = vmatprep.subr.bf16.mxu0 %v4142_v37  ;;  %3819 = vmatprep.subr.bf16.mxu1 %v4142_v37 }
 0x286   :  { %3808 = vmatpush3.bf16.msra.mxu0 %v4046_v50  ;;  %3820 = vmatpush3.bf16.msra.mxu1 %v4047_v51 }
 0x287   :  { %3825 = vmatprep.subr.bf16.mxu0 %v4142_v37  ;;  %3837 = vmatprep.subr.bf16.mxu1 %v4142_v37 }
 0x289   :  { %3810 = vmatmul.mubr.msk.bf16.vlgmr.msra.gmra.mrb[4].mxu0 %vm1580_vm1, %v1741_v52  ;;  %3822 = vmatmul.mubr.msk.bf16.vlgmr.msra.gmra.mrb[4].mxu1 %vm1580_vm1, %v1822_v54 }
 0x28a   :  { %3826 = vmatpush3.bf16.msra.mxu0 %v4048_v53  ;;  %3838 = vmatpush3.bf16.msra.mxu1 %v4049_v55 }
 0x28b   :  { %3827 = vmatprep.subr.bf16.mxu0 %v4142_v37  ;;  %3839 = vmatprep.subr.bf16.mxu1 %v4142_v37 }
 0x28c   :  { %3833 = vmatprep.mubr.msk.bf16.mxu0 %vm4143_vm2, %v4142_v37  ;;  %3845 = vmatprep.mubr.msk.bf16.mxu1 %vm4143_vm2, %v4142_v37 }
 0x28e   :  { %3828 = vmatpush3.bf16.msra.mxu0 %v4050_v56  ;;  %3840 = vmatpush3.bf16.msra.mxu1 %v4051_v47 }
 0x28f   :  { %3829 = vmatprep.subr.bf16.mxu0 %v4142_v37  ;;  %3841 = vmatprep.subr.bf16.mxu1 %v4142_v37 }
 0x292   :  { %3830 = vmatpush3.bf16.msra.mxu0 %v4052_v57  ;;  %3842 = vmatpush3.bf16.msra.mxu1 %v4053_v58 }
 0x293   :  { %3831 = vmatprep.subr.bf16.mxu0 %v4142_v37  ;;  %3843 = vmatprep.subr.bf16.mxu1 %v4142_v37 }
 0x296   :  { %3832 = vmatpush3.bf16.msra.mxu0 %v4054_v59  ;;  %3844 = vmatpush3.bf16.msra.mxu1 %v4055_v60 }
 0x297   :  { %3849 = vmatprep.subr.bf16.mxu0 %v4142_v37  ;;  %3861 = vmatprep.subr.bf16.mxu1 %v4142_v37 }
 0x299   :  { %3834 = vmatmul.mubr.msk.bf16.vlgmr.msra.gmra.mrb[8].mxu0 %vm1580_vm1, %v1902_v62  ;;  %3846 = vmatmul.mubr.msk.bf16.vlgmr.msra.gmra.mrb[8].mxu1 %vm1580_vm1, %v1982_v49 }
 0x29a   :  { %3850 = vmatpush3.bf16.msra.mxu0 %v4056_v1  ;;  %3862 = vmatpush3.bf16.msra.mxu1 %v4057_v2 }
 0x29b   :  { %3851 = vmatprep.subr.bf16.mxu0 %v4142_v37  ;;  %3863 = vmatprep.subr.bf16.mxu1 %v4142_v37 }
 0x29c   :  { %3857 = vmatprep.mubr.msk.bf16.mxu0 %vm4143_vm2, %v4142_v37  ;;  %3869 = vmatprep.mubr.msk.bf16.mxu1 %vm4143_vm2, %v4142_v37 }
 0x29e   :  { %3852 = vmatpush3.bf16.msra.mxu0 %v4058_v3  ;;  %3864 = vmatpush3.bf16.msra.mxu1 %v4059_v4 }
 0x29f   :  { %3853 = vmatprep.subr.bf16.mxu0 %v4142_v37  ;;  %3865 = vmatprep.subr.bf16.mxu1 %v4142_v37 }
 0x2a2   :  { %3854 = vmatpush3.bf16.msra.mxu0 %v4060_v5  ;;  %3866 = vmatpush3.bf16.msra.mxu1 %v4061_v6 }
 0x2a3   :  { %3855 = vmatprep.subr.bf16.mxu0 %v4142_v37  ;;  %3867 = vmatprep.subr.bf16.mxu1 %v4142_v37 }
 0x2a6   :  { %3856 = vmatpush3.bf16.msra.mxu0 %v4062_v7  ;;  %3868 = vmatpush3.bf16.msra.mxu1 %v4063_v8 }
 0x2a7   :  { %3873 = vmatprep.subr.bf16.mxu0 %v4142_v37  ;;  %2437 = vmatprep.subr.bf16.mxu1 %v4070_v18 }
 0x2a9   :  { %3858 = vmatmul.mubr.msk.bf16.vlgmr.msra.gmra.mrb[12].mxu0 %vm1580_vm1, %v2063_v9  ;;  %3870 = vmatmul.mubr.msk.bf16.vlgmr.msra.gmra.mrb[12].mxu1 %vm1580_vm1, %v2143_v11 }
 0x2aa   :  { %3874 = vmatpush3.bf16.msra.mxu0 %v4064_v10  ;;  %3881 = vmatprep.mubr.msk.bf16.mxu0 %vm4143_vm2, %v4142_v37 }
 0x2ab   :  { %3875 = vmatprep.subr.bf16.mxu0 %v4142_v37  ;;  %2438 = vmatpush1.bf16.msra.mxu1 %v4068_v19 }
 0x2ac   :  { %2439 = vmatprep.subr.bf16.mxu1 %v4076_v21  ;;  %2469 = vmatprep.mubr.bf16.mxu1 %v4144_v32 }
 0x2ae   :  { %3876 = vmatpush3.bf16.msra.mxu0 %v4065_v13 }
 0x2af   :  { %3877 = vmatprep.subr.bf16.mxu0 %v4142_v37  ;;  %2440 = vmatpush1.bf16.msra.mxu1 %v4074_v23 }
 0x2b0   :  { %2441 = vmatprep.subr.bf16.mxu1 %v4082_v63 }
 0x2b2   :  { %3878 = vmatpush3.bf16.msra.mxu0 %v4066_v15 }
 0x2b3   :  { %3879 = vmatprep.subr.bf16.mxu0 %v4142_v37  ;;  %2442 = vmatpush1.bf16.msra.mxu1 %v4080_v26 }
 0x2b4   :  { %2443 = vmatprep.subr.bf16.mxu1 %v4088_v28 }
 0x2b6   :  { %3880 = vmatpush3.bf16.msra.mxu0 %v4067_v16 }
 0x2b7   :  { %2480 = vmatprep.subr.bf16.mxu0 %v4073_v61  ;;  %2444 = vmatpush1.bf16.msra.mxu1 %v4086_v30  ;;  %v3316_v61 = vld [vmem:[%s4991_s6] ss:$0 sm:$0xff] }
 0x2b8   :  { %3621 = vmatprep.subr.bf16.mxu1 %v4092_v34  ;;  %v4095_v30 = vld [vmem:[%s4994_s9 + $0x80] sm:$0xff]  }
 0x2b9   :  { %3882 = vmatmul.mubr.msk.bf16.vlgmr.msra.gmra.mrb[16].mxu0 %vm1580_vm1, %v2223_v17 }
 0x2ba   :  { %2481 = vmatpush1.bf16.msra.mxu0 %v4071_v20  ;;  %2512 = vmatprep.mubr.bf16.mxu0 %v4144_v32  ;;  %v4097_v32 = vld [vmem:[%s4994_s9 + $0xc8] sm:$0xff]  }
 0x2bb   :  { %2482 = vmatprep.subr.bf16.mxu0 %v4079_v22 }
 0x2be   :  { %2483 = vmatpush1.bf16.msra.mxu0 %v4077_v24 }
 0x2bf   :  { %2484 = vmatprep.subr.bf16.mxu0 %v4085_v25 }
 0x2c2   :  { %2485 = vmatpush1.bf16.msra.mxu0 %v4083_v27 }
 0x2c3   :  { %2486 = vmatprep.subr.bf16.mxu0 %v4091_v29  ;;  %v4094_v29 = vld [vmem:[%s4994_s9] sm:$0xff]  }
 0x2c6   :  { %2487 = vmatpush1.bf16.msra.mxu0 %v4089_v31  ;;  %v4096_v31 = vld [vmem:[%s4994_s9 + $0x48] sm:$0xff]  }
 0x2c7   :  { %3643 = vmatprep.subr.bf16.mxu0 %v4093_v36  ;;  %v4098_v36 = vld [vmem:[%s4994_s9 + $0x8] sm:$0xff]  }
 0x34c   :  { %v1666_v37 = vpop.f32.mrb[0].mxu0  ;;  %v1734_v38 = vpop.f32.mrb[0].mxu1 }
 0x34d   :  { %v3787_v39 = vpop.f32.mrb[1].mxu0  ;;  %v1735_v12 = vadd.f32 %v1734_v38, %v1666_v37  ;;  %v3799_v14 = vpop.f32.mrb[1].mxu1  ;;  %v4099_v37 = vld [vmem:[%s4994_s9 + $0x88] sm:$0xff]   ;;  %v4100_v38 = vld [vmem:[%s4994_s9 + $0x50] sm:$0xff]  }
 0x34e   :  { %v1669_v40 = vpop.f32.mrb[2].mxu0  ;;  %v1737_v0 = vpop.f32.mrb[2].mxu1  ;;  %v4101_v39 = vld [vmem:[%s4994_s9 + $0xd0] sm:$0xff]  }
 0x34f   :  { %v3788_v33 = vpop.f32.mrb[3].mxu0  ;;  %v1738_v41 = vadd.f32 %v1737_v0, %v1669_v40  ;;  %v3800_v42 = vpop.f32.mrb[3].mxu1  ;;  %v4103_v14 = vld [vmem:[%s4994_s9 + $0x90] sm:$0xff]   ;;  %v4104_v40 = vld [vmem:[%s4994_s9 + $0x58] sm:$0xff]  }
 0x350   :  { %v4105_v0 = vld [vmem:[%s4994_s9 + $0xd8] sm:$0xff]   ;;  %v4108_v42 = vld [vmem:[%s4994_s9 + $0x60] sm:$0xff]  }
 0x351   :  { %v4106_v33 = vld [vmem:[%s4994_s9 + $0x18] sm:$0xff]  }
 0x35c   :  { %v1812_v43 = vpop.f32.mrb[4].mxu0  ;;  %v1893_v35 = vpop.f32.mrb[4].mxu1 }
 0x35d   :  { %v1819_v44 = vadd.f32 %v1812_v43, %v1735_v12  ;;  %v3811_v45 = vpop.f32.mrb[5].mxu0  ;;  %v3823_v48 = vpop.f32.mrb[5].mxu1  ;;  %v4102_v12 = vld [vmem:[%s4994_s9 + $0x10] sm:$0xff]   ;;  %v4109_v43 = vld [vmem:[%s4994_s9 + $0xe0] sm:$0xff]  }
 0x35e   :  { %v1815_v46 = vpop.f32.mrb[6].mxu0  ;;  %v1896_v53 = vpop.f32.mrb[6].mxu1  ;;  %v4111_v45 = vld [vmem:[%s4994_s9 + $0xa0] sm:$0xff]   ;;  %v4114_v48 = vld [vmem:[%s4994_s9 + $0x28] sm:$0xff]  }
 0x35f   :  { %v1820_v50 = vadd.f32 %v1815_v46, %v1738_v41  ;;  %v1900_v51 = vadd.f32 %v1893_v35, %v1819_v44  ;;  %v3812_v52 = vpop.f32.mrb[7].mxu0  ;;  %v3824_v54 = vpop.f32.mrb[7].mxu1  ;;  %v4107_v41 = vld [vmem:[%s4994_s9 + $0x98] sm:$0xff]   ;;  %v4110_v44 = vld [vmem:[%s4994_s9 + $0x20] sm:$0xff]   ;;  %v4112_v35 = vld [vmem:[%s4994_s9 + $0x68] sm:$0xff]  }
 0x360   :  { %v4113_v46 = vld [vmem:[%s4994_s9 + $0xe8] sm:$0xff]   ;;  %v4117_v52 = vld [vmem:[%s4994_s9 + $0xf0] sm:$0xff]  }
 0x361   :  { %v1901_v55 = vadd.f32 %v1896_v53, %v1820_v50  ;;  %v4115_v50 = vld [vmem:[%s4994_s9 + $0xa8] sm:$0xff]   ;;  %v4118_v53 = vld [vmem:[%s4994_s9 + $0x30] sm:$0xff]  }
 0x362   :  { %v4119_v54 = vld [vmem:[%s4994_s9 + $0xb0] sm:$0xff]  }
 0x36c   :  { %v1973_v56 = vpop.f32.mrb[8].mxu0  ;;  %v2053_v58 = vpop.f32.mrb[8].mxu1 }
 0x36d   :  { %v1980_v47 = vadd.f32 %v1973_v56, %v1900_v51  ;;  %v3835_v57 = vpop.f32.mrb[9].mxu0  ;;  %v3847_v60 = vpop.f32.mrb[9].mxu1  ;;  %v4116_v51 = vld [vmem:[%s4994_s9 + $0x70] sm:$0xff]   ;;  %v4121_v56 = vld [vmem:[%s4994_s9 + $0xf8] sm:$0xff]  }
 0x36e   :  { %v1976_v59 = vpop.f32.mrb[10].mxu0  ;;  %v2056_v2 = vpop.f32.mrb[10].mxu1  ;;  %v4123_v57 = vld [vmem:[%s4994_s9 + $0xb8] sm:$0xff]  }
 0x36f   :  { %v1981_v62 = vadd.f32 %v1976_v59, %v1901_v55  ;;  %v2060_v1 = vadd.f32 %v2053_v58, %v1980_v47  ;;  %v3836_v49 = vpop.f32.mrb[11].mxu0  ;;  %v3848_v3 = vpop.f32.mrb[11].mxu1  ;;  %v4120_v55 = vld [vmem:[%s4994_s9 + $0x78] sm:$0xff]   ;;  %v2334_v58 = vlaneseq }
 0x370   :  { %v4122_v47 = vld [vmem:[%s4994_s9 + $0x38] sm:$0xff]  }
 0x371   :  { %v2061_v4 = vadd.f32 %v2056_v2, %v1981_v62  ;;  %v2335_v59 = vshrl.u32 %v2334_v58, 7 }
 0x373   :  { %v2336_v60 = vsub.s32 0, %v2335_v59  ;;  %v2344_v62 = vsub.s32 2, %v2335_v59  ;;  %v2340_v49 = vsub.s32 1, %v2335_v59  ;;  %v2348_v2 = vsub.s32 3, %v2335_v59 }
 0x37c   :  { %v2134_v5 = vpop.f32.mrb[12].mxu0  ;;  %v2214_v8 = vpop.f32.mrb[12].mxu1 }
 0x37d   :  { %v2141_v6 = vadd.f32 %v2134_v5, %v2060_v1  ;;  %v3859_v7 = vpop.f32.mrb[13].mxu0  ;;  %v3871_v10 = vpop.f32.mrb[13].mxu1  ;;  %v2332_v1 = vld [vmem:[%s4993_s8] sm:$0xf] }
 0x37e   :  { %v2137_v9 = vpop.f32.mrb[14].mxu0  ;;  %v2217_v16 = vpop.f32.mrb[14].mxu1  ;;  %v2337_v3 = vrot.slane %v2332_v1, %v2336_v60  ;;  %v2341_v5 = vrot.slane %v2332_v1, %v2340_v49 }
 0x37f   :  { %v2142_v11 = vadd.f32 %v2137_v9, %v2061_v4  ;;  %v2221_v13 = vadd.f32 %v2214_v8, %v2141_v6  ;;  %v3860_v15 = vpop.f32.mrb[15].mxu0  ;;  %v3872_v17 = vpop.f32.mrb[15].mxu1  ;;  %v2345_v4 = vrot.slane %v2332_v1, %v2344_v62  ;;  %v2349_v6 = vrot.slane %v2332_v1, %v2348_v2 }
 0x381   :  { %v2222_v18 = vadd.f32 %v2217_v16, %v2142_v11 }
 0x38c   :  { %v2294_v19 = vpop.f32.mrb[16].mxu0 }
 0x38d   :  { %v2301_v20 = vadd.f32 %v2294_v19, %v2221_v13  ;;  %v3883_v21 = vpop.f32.mrb[17].mxu0 }
 0x38e   :  { %v2297_v22 = vpop.f32.mrb[18].mxu0 }
 0x38f   :  { %v2309_v23 = vadd.f32 %v3316_v61, %v2301_v20  ;;  %v2302_v24 = vadd.f32 %v2297_v22, %v2222_v18  ;;  %v3884_v63 = vpop.f32.mrb[19].mxu0 }
 0x391   :  { %v2310_v25 = vadd.f32 %v3316_v61, %v2302_v24  ;;  %v2311_v26 = vmax.f32 %v2309_v23, 0.0 }
 0x393   :  { %v2312_v27 = vmax.f32 %v2310_v25, 0.0 }
 0x395   :  { %v2313_v28 = vpack.c.bf16 %v2312_v27, %v2311_v26 }
 0x397   :  { %2314 = vst.msk [vmem:[#allocation4] sm:$0xff] %vm1580_vm1, %v2313_v28 }
 0x39e   :  { %v2315_v34 = vld [vmem:[#allocation4] sm:$0xff] }
 0x39f   :  { %3333 = vmatmul.mubr.msk.bf16.vlgmr.msra.gmra.mrb[16].mxu1 %vm1580_vm1, %v2315_v34  ;;  %3334 = vmatmul.mubr.msk.bf16.vlgmr.msra.gmra.mrb[20].mxu0 %vm1580_vm1, %v2315_v34 }
 0x3a0   :  { %3622 = vmatpush3.bf16.msra.mxu1 %v4094_v29  ;;  %3644 = vmatpush3.bf16.msra.mxu0 %v4095_v30 }
 0x3a1   :  { %3623 = vmatprep.subr.bf16.mxu1 %v4096_v31  ;;  %3645 = vmatprep.subr.bf16.mxu0 %v4097_v32 }
 0x3a4   :  { %3624 = vmatpush3.bf16.msra.mxu1 %v4098_v36  ;;  %3646 = vmatpush3.bf16.msra.mxu0 %v4099_v37 }
 0x3a5   :  { %3625 = vmatprep.subr.bf16.mxu1 %v4100_v38  ;;  %3647 = vmatprep.subr.bf16.mxu0 %v4101_v39  ;;  %v3335_v39 = vld [vmem:[%s4995_s10] ss:$0 sm:$0xff] }
 0x3a8   :  { %3626 = vmatpush3.bf16.msra.mxu1 %v4102_v12  ;;  %3648 = vmatpush3.bf16.msra.mxu0 %v4103_v14 }
 0x3a9   :  { %3627 = vmatprep.subr.bf16.mxu1 %v4104_v40  ;;  %3649 = vmatprep.subr.bf16.mxu0 %v4105_v0 }
 0x3ac   :  { %3628 = vmatpush3.bf16.msra.mxu1 %v4106_v33  ;;  %3650 = vmatpush3.bf16.msra.mxu0 %v4107_v41 }
 0x3ad   :  { %3629 = vmatprep.subr.bf16.mxu1 %v4108_v42  ;;  %3651 = vmatprep.subr.bf16.mxu0 %v4109_v43 }
 0x3b0   :  { %3630 = vmatpush3.bf16.msra.mxu1 %v4110_v44  ;;  %3652 = vmatpush3.bf16.msra.mxu0 %v4111_v45 }
 0x3b1   :  { %3631 = vmatprep.subr.bf16.mxu1 %v4112_v35  ;;  %3653 = vmatprep.subr.bf16.mxu0 %v4113_v46 }
 0x3b4   :  { %3632 = vmatpush3.bf16.msra.mxu1 %v4114_v48  ;;  %3654 = vmatpush3.bf16.msra.mxu0 %v4115_v50 }
 0x3b5   :  { %3633 = vmatprep.subr.bf16.mxu1 %v4116_v51  ;;  %3655 = vmatprep.subr.bf16.mxu0 %v4117_v52 }
 0x3b8   :  { %3634 = vmatpush3.bf16.msra.mxu1 %v4118_v53  ;;  %3656 = vmatpush3.bf16.msra.mxu0 %v4119_v54 }
 0x3b9   :  { %3635 = vmatprep.subr.bf16.mxu1 %v4120_v55  ;;  %3657 = vmatprep.subr.bf16.mxu0 %v4121_v56 }
 0x3bc   :  { %3636 = vmatpush3.bf16.msra.mxu1 %v4122_v47  ;;  %3658 = vmatpush3.bf16.msra.mxu0 %v4123_v57 }
 0x472   :  { %v2471_v7 = vpop.f32.mrb[16].mxu1  ;;  %v2514_v8 = vpop.f32.mrb[20].mxu0 }
 0x473   :  { %v2472_v9 = vadd.f32 %v2471_v7, %v2337_v3  ;;  %v2515_v10 = vadd.f32 %v2514_v8, %v2345_v4  ;;  %v2473_v11 = vpop.f32.mrb[17].mxu1  ;;  %v2516_v13 = vpop.f32.mrb[21].mxu0 }
 0x474   :  { %v2474_v15 = vadd.f32 %v2473_v11, %v2341_v5  ;;  %v2517_v16 = vadd.f32 %v2516_v13, %v2349_v6  ;;  %v2475_v17 = vpop.f32.mrb[18].mxu1  ;;  %v2518_v18 = vpop.f32.mrb[22].mxu0 }
 0x475   :  { %v2476_v61 = vadd.f32 %v2475_v17, %v2337_v3  ;;  %v2519_v19 = vadd.f32 %v2518_v18, %v2345_v4  ;;  %v2477_v20 = vpop.f32.mrb[19].mxu1  ;;  %v2520_v21 = vpop.f32.mrb[23].mxu0  ;;  %v2523_v24 = vmax.f32 %v2472_v9, 0.0  ;;  %v2525_v63 = vmax.f32 %v2515_v10, 0.0 }
 0x476   :  { %v2478_v22 = vadd.f32 %v2477_v20, %v2341_v5  ;;  %v2521_v23 = vadd.f32 %v2520_v21, %v2349_v6  ;;  %v2524_v27 = vmax.f32 %v2474_v15, 0.0  ;;  %v2526_v28 = vmax.f32 %v2517_v16, 0.0 }
 0x477   :  { %v2527_v25 = vmax.f32 %v2476_v61, 0.0  ;;  %v2529_v26 = vmax.f32 %v2519_v19, 0.0 }
 0x478   :  { %v2528_v29 = vmax.f32 %v2478_v22, 0.0  ;;  %v2530_v30 = vmax.f32 %v2521_v23, 0.0 }
 0x479   :  { %v2531_v31 = vpack.c.bf16 %v2527_v25, %v2523_v24  ;;  %v2533_v32 = vpack.c.bf16 %v2529_v26, %v2525_v63 }
 0x47a   :  { %v2532_v34 = vpack.c.bf16 %v2528_v29, %v2524_v27  ;;  %v2534_v36 = vpack.c.bf16 %v2530_v30, %v2526_v28 }
 0x47c   :  { %2830 = vmatprep.mubr.bf16.mxu1 %v2532_v34  ;;  %2871 = vmatprep.mubr.bf16.mxu0 %v2534_v36 }
 0x47d   :  { %2831 = vmatmul.mubr.bf16.vlgmr.msra.gmra.mrb[20].mxu1 %v2531_v31  ;;  %2872 = vmatmul.mubr.bf16.vlgmr.msra.gmra.mrb[24].mxu0 %v2533_v32 }
 0x550   :  { %v3637_v37 = vpop.f32.mrb[20].mxu1  ;;  %v3659_v38 = vpop.f32.mrb[24].mxu0 }
 0x551   :  { %v3638_v12 = vpop.f32.mrb[21].mxu1  ;;  %v3660_v14 = vpop.f32.mrb[25].mxu0 }
 0x552   :  { %v3639_v40 = vadd.f32 %v3638_v12, %v3637_v37  ;;  %v3661_v0 = vadd.f32 %v3660_v14, %v3659_v38  ;;  %v3640_v33 = vpop.f32.mrb[22].mxu1  ;;  %v3662_v41 = vpop.f32.mrb[26].mxu0 }
 0x553   :  { %v3641_v42 = vpop.f32.mrb[23].mxu1  ;;  %v3663_v43 = vpop.f32.mrb[27].mxu0 }
 0x554   :  { %v2833_v44 = vadd.f32 %v3639_v40, %v3335_v39  ;;  %v3642_v45 = vadd.f32 %v3641_v42, %v3640_v33  ;;  %v3664_v35 = vadd.f32 %v3663_v43, %v3662_v41 }
 0x556   :  { %v2874_v46 = vadd.f32 %v3661_v0, %v2833_v44  ;;  %v2836_v48 = vadd.f32 %v3642_v45, %v3335_v39 }
 0x558   :  { %2880 = vst [vmem:[%s4996_s11] sm:$0xff] %v2874_v46  ;;  %v2877_v50 = vadd.f32 %v3664_v35, %v2836_v48 }
 0x55a   :  { %2881 = vst [vmem:[%s4996_s11 + $0x8] sm:$0xff] %v2877_v50 }

</bundles_post_ra>
